<compile_context>
chip_gen: v7x
topology: tpu7x:2x2x1
jax: 0.10.0
libtpu: 0.0.40
codegen_flags: <defaults>
</compile_context>

<pallas_src>
import functools

import jax
import jax.numpy as jnp
from jax import lax
from jax.experimental import pallas as pl
from jax.experimental.pallas import tpu as pltpu


def _round_up(x, m):
    return (x + m - 1) // m * m


def _cdiv(a, b):
    return (a + b - 1) // b


# ----------------------------- Pallas kernel ------------------------------ #

def _rvq_kernel(x_ref, w_in_ref, b_in_ref, emb_ref, e2_ref, w_out_ref,
                b_out_ref, quant_ref, codes_ref, res_ref):
    """One group of GK VQ layers for one token tile.

    grid = (n_token_tiles, n_groups); the group axis is innermost ("arbitrary").

    x_ref:     (TN, D)      tokens (resident across the group axis)
    w_in_ref:  (GK, D, Dc)  project_in weights (bf16, resident / per-group)
    b_in_ref:  (GK, 1, Dc)  project_in biases (f32)
    emb_ref:   (GK, Q, Dc)  codebooks (bf16)
    e2_ref:    (GK, 1, Q)   precomputed ||e||^2 (f32)
    w_out_ref: (GK, Dc, D)  project_out weights (bf16)
    b_out_ref: (GK, 1, D)   project_out biases (f32)
    quant_ref: (TN, D)      output accumulator (resident across group axis)
    codes_ref: (TN, GK)     codes for this group, flushed once per (tile, group)
    res_ref:   (TN, D)      VMEM scratch: residual carried across groups
    """
    g = pl.program_id(1)

    @pl.when(g == 0)
    def _():
        res_ref[...] = x_ref[...]
        quant_ref[...] = jnp.zeros_like(quant_ref)

    gk = w_in_ref.shape[0]
    tn = x_ref.shape[0]
    q = emb_ref.shape[1]

    # Hoisted out of the layer loop (JAX does not CSE broadcast_in_dim).
    q_iota = lax.broadcasted_iota(jnp.int32, (tn, q), 1)
    lane_k = lax.broadcasted_iota(jnp.int32, (tn, gk), 1)
    big = jnp.int32(jnp.iinfo(jnp.int32).max)

    def layer(k, carry):
        res, quant, codes_acc = carry
        emb = emb_ref[k]                                              # (Q, Dc) bf16
        # project_in (bf16 MXU operands, f32 accumulation)
        xc = jnp.dot(res.astype(jnp.bfloat16), w_in_ref[k],
                     preferred_element_type=jnp.float32) + b_in_ref[k]
        # nearest code: argmin over (||e||^2 - 2 x.e); ||x||^2 is row-constant.
        xe = lax.dot_general(xc.astype(jnp.bfloat16), emb,
                             dimension_numbers=(((1,), (1,)), ((), ())),
                             preferred_element_type=jnp.float32)      # (TN, Q)
        dist = e2_ref[k] - 2.0 * xe
        minval = jnp.min(dist, axis=-1, keepdims=True)
        codes_col = jnp.min(jnp.where(dist == minval, q_iota, big),
                            axis=-1, keepdims=True)                   # (TN, 1)
        # codebook gather via one-hot matmul (exact: 1.0 x bf16 rows)
        onehot = (codes_col == q_iota).astype(jnp.bfloat16)
        quant_c = jnp.dot(onehot, emb, preferred_element_type=jnp.float32)
        # project_out
        qout = jnp.dot(quant_c.astype(jnp.bfloat16), w_out_ref[k],
                       preferred_element_type=jnp.float32) + b_out_ref[k]
        codes_acc = jnp.where(lane_k == k, codes_col, codes_acc)
        return res - qout, quant + qout, codes_acc

    carry = (res_ref[...], quant_ref[...], jnp.zeros((tn, gk), jnp.int32))
    if gk <= 8:                      # fully unrolled, static weight slicing
        for k in range(gk):
            carry = layer(k, carry)
    else:                            # rolled loop, dynamic weight slicing
        carry = lax.fori_loop(0, gk, layer, carry)
    res, quant, codes_acc = carry

    res_ref[...] = res
    quant_ref[...] = quant
    codes_ref[...] = codes_acc       # lane-dense, one flush per (tile, group)


# --------------------------- VMEM budget helpers --------------------------- #

def _pad_sub(r):
    return _round_up(max(int(r), 1), 8)


def _pad_lane(c):
    return _round_up(max(int(c), 1), 128)


def _per_layer_weight_bytes(d, dc, q):
    bf16, f32 = 2, 4
    return (_pad_sub(d) * _pad_lane(dc) * bf16 +      # w_in
            _pad_sub(1) * _pad_lane(dc) * f32 +       # b_in
            _pad_sub(q) * _pad_lane(dc) * bf16 +      # embedding
            _pad_sub(1) * _pad_lane(q) * f32 +        # ||e||^2
            _pad_sub(dc) * _pad_lane(d) * bf16 +      # w_out
            _pad_sub(1) * _pad_lane(d) * f32)         # b_out


def _tile_bytes(tn, d, dc, q, gk):
    f32 = 4
    b = 0
    b += 2 * _pad_sub(tn) * _pad_lane(d) * f32        # x (double-buffered)
    b += 2 * _pad_sub(tn) * _pad_lane(d) * f32        # quantized out (db)
    b += 2 * _pad_sub(tn) * _pad_lane(gk) * f32       # codes out (db)
    b += _pad_sub(tn) * _pad_lane(d) * f32            # residual scratch
    b += 3 * _pad_sub(tn) * _pad_lane(q) * f32        # xe / dist / one-hot
    b += 2 * _pad_sub(tn) * _pad_lane(dc) * f32       # xc / quant_c
    return b


def _vmem_capacity_bytes():
    try:
        info = pltpu.get_tpu_info()
        cap = getattr(info, "vmem_capacity_bytes", None)
        if cap:
            return int(cap)
    except Exception:
        pass
    return 64 * 1024 * 1024          # conservative fallback (v7x-sized)


def _choose_group_size(kq, tn, d, dc, q, budget):
    """Largest number of layers whose stacked weights fit the VMEM budget."""
    per_layer = 2 * _per_layer_weight_bytes(d, dc, q)   # x2 for pipeline buffers

    def fits(g):
        return _tile_bytes(tn, d, dc, q, g) + g * per_layer <= budget

    best = 1
    for g in range(1, kq + 1):
        if fits(g):
            best = g
    if best < kq:
        # prefer a divisor of kq to avoid padded (zero) layers
        for g in range(best, 0, -1):
            if kq % g == 0 and fits(g):
                return g
    return best


# ----------------------------- pallas_call wrapper ------------------------- #

def _rvq_pallas(xf, w_in_s, b_in_s, emb_s, e2_s, w_out_s, b_out_s,
                tile_n, group_k, vmem_limit):
    n_pad, d = xf.shape
    k_pad, _, dc = w_in_s.shape
    q = emb_s.shape[1]
    n_tiles = n_pad // tile_n
    n_groups = k_pad // group_k

    grid_spec = pltpu.PrefetchScalarGridSpec(
        num_scalar_prefetch=0,
        grid=(n_tiles, n_groups),
        in_specs=[
            pl.BlockSpec((tile_n, d), lambda i, g: (i, 0)),           # x
            pl.BlockSpec((group_k, d, dc), lambda i, g: (g, 0, 0)),   # w_in
            pl.BlockSpec((group_k, 1, dc), lambda i, g: (g, 0, 0)),   # b_in
            pl.BlockSpec((group_k, q, dc), lambda i, g: (g, 0, 0)),   # embedding
            pl.BlockSpec((group_k, 1, q), lambda i, g: (g, 0, 0)),    # ||e||^2
            pl.BlockSpec((group_k, dc, d), lambda i, g: (g, 0, 0)),   # w_out
            pl.BlockSpec((group_k, 1, d), lambda i, g: (g, 0, 0)),    # b_out
        ],
        out_specs=(
            pl.BlockSpec((tile_n, d), lambda i, g: (i, 0)),                 # quantized
            pl.BlockSpec((None, tile_n, group_k), lambda i, g: (g, i, 0)),  # codes
        ),
        scratch_shapes=[pltpu.VMEM((tile_n, d), jnp.float32)],        # residual carry
    )

    flops = 2 * n_pad * k_pad * (d * dc + 2 * q * dc + dc * d)
    bytes_accessed = (2 * n_pad * d * 4 + n_pad * k_pad * 4 +
                      (w_in_s.size + emb_s.size + w_out_s.size) * 2 +
                      (b_in_s.size + e2_s.size + b_out_s.size) * 4)

    return pl.pallas_call(
        _rvq_kernel,
        grid_spec=grid_spec,
        out_shape=(
            jax.ShapeDtypeStruct((n_pad, d), jnp.float32),
            jax.ShapeDtypeStruct((n_groups, n_pad, group_k), jnp.int32),
        ),
        compiler_params=pltpu.CompilerParams(
            dimension_semantics=("parallel", "arbitrary"),
            vmem_limit_bytes=int(vmem_limit)),
        cost_estimate=pl.CostEstimate(flops=int(flops), transcendentals=0,
                                      bytes_accessed=int(bytes_accessed)),
    )(xf, w_in_s, b_in_s, emb_s, e2_s, w_out_s, b_out_s)


# ------------------------------ JAX wrapper -------------------------------- #

@functools.partial(jax.jit, static_argnames=("n_q", "tile_n"))
def rvq_forward(x, params, n_q=None, tile_n=512):
    """ResidualVectorQuantization.forward (eval mode).

    x: [B, D, T]
    Returns (quantized_out [B, D, T], codes [K, B, T], losses [K], metrics {}).
    """
    b, d, t = x.shape
    n_layers = len(params)
    kq = n_layers if n_q is None else min(n_q, n_layers)
    n = b * t

    # Layout change hoisted out of the layer loop: [B, D, T] -> [(B*T), D] once.
    xf = jnp.transpose(x, (0, 2, 1)).reshape(n, d).astype(jnp.float32)

    # >= 2 token tiles so the "parallel" axis can shard across both v7x cores.
    # (For real workloads D / Dc should be chosen as multiples of 128; the toy
    #  sizes below rely on full-extent last dims instead.)
    tn = min(int(tile_n), max(8, _round_up(_cdiv(n, 2), 8)))
    n_pad = _round_up(n, tn)
    if n_pad != n:
        xf = jnp.pad(xf, ((0, n_pad - n), (0, 0)))

    # Stack per-layer weights along a leading layer axis (bf16 MXU operands).
    w_in_s = jnp.stack([p[0] for p in params[:kq]]).astype(jnp.bfloat16)   # [K, D, Dc]
    b_in_s = jnp.stack([p[1] for p in params[:kq]]).astype(jnp.float32)    # [K, 1, Dc]
    emb_s = jnp.stack([p[2] for p in params[:kq]]).astype(jnp.bfloat16)    # [K, Q, Dc]
    w_out_s = jnp.stack([p[3] for p in params[:kq]]).astype(jnp.bfloat16)  # [K, Dc, D]
    b_out_s = jnp.stack([p[4] for p in params[:kq]]).astype(jnp.float32)   # [K, 1, D]
    dc = w_in_s.shape[2]
    q = emb_s.shape[1]

    # Generation-aware VMEM budget (~108 MiB v5e/v6e, ~54 MiB v7x) and the
    # weight-residency decision against it: group_k == kq means fully-resident
    # weights (fetched once); otherwise weight groups are streamed per tile.
    vmem_limit = int(0.85 * _vmem_capacity_bytes())
    group_k = _choose_group_size(kq, tn, d, dc, q, vmem_limit - (2 << 20))
    n_groups = _cdiv(kq, group_k)
    k_pad = n_groups * group_k
    if k_pad != kq:
        # Zero-padded layers are exact no-ops (code 0, zero dequant, residual
        # unchanged); their codes are sliced off below.
        padk = ((0, k_pad - kq), (0, 0), (0, 0))
        w_in_s = jnp.pad(w_in_s, padk)
        b_in_s = jnp.pad(b_in_s, padk)
        emb_s = jnp.pad(emb_s, padk)
        w_out_s = jnp.pad(w_out_s, padk)
        b_out_s = jnp.pad(b_out_s, padk)

    # ||e||^2 once per layer from the bf16-rounded codebook (consistent with
    # the bf16 x.e matmul inside the kernel).
    emb_f32 = emb_s.astype(jnp.float32)
    e2_s = jnp.sum(emb_f32 * emb_f32, axis=-1)[:, None, :]                 # [Kp, 1, Q]

    quant_flat, codes_grp = _rvq_pallas(xf, w_in_s, b_in_s, emb_s, e2_s,
                                        w_out_s, b_out_s, tn, group_k,
                                        vmem_limit)

    quantized_out = jnp.transpose(quant_flat[:n].reshape(b, t, d), (0, 2, 1))
    # codes_grp: [n_groups, n_pad, group_k] -> [K, B, T]
    codes = jnp.transpose(codes_grp, (0, 2, 1)).reshape(k_pad, n_pad)
    codes = codes[:kq, :n].reshape(kq, b, t)
    losses = jnp.zeros((kq,), jnp.float32)   # eval mode: zero_scalar per layer
    return quantized_out, codes, losses, {}


# -------------------------- deterministic params --------------------------- #

def make_params(key, num_quantizers, dim, codebook_dim, codebook_size,
                epsilon=1e-5):
    """Deterministic synthetic parameters mirroring the module's __init__ shapes."""
    params = []
    for i in range(num_quantizers):
        ks = jax.random.split(jax.random.fold_in(key, i), 6)
        # nn.Linear(dim, codebook_dim): weight [codebook_dim, dim]; stored transposed.
        w_in = jax.random.normal(ks[0], (dim, codebook_dim), jnp.float32) * 0.1
        b_in = jax.random.normal(ks[1], (1, codebook_dim), jnp.float32) * 0.01
        # EuclideanCodebook buffers: embedding = embedding_sum / clamp(cluster_usage, eps)
        embedding_sum = jax.random.normal(ks[2], (codebook_size, codebook_dim),
                                          jnp.float32)
        cluster_usage = jax.random.uniform(ks[3], (codebook_size,), jnp.float32,
                                           minval=0.5, maxval=2.0)
        emb = embedding_sum / jnp.clip(cluster_usage, epsilon, None)[:, None]
        # nn.Linear(codebook_dim, dim): weight [dim, codebook_dim]; stored transposed.
        w_out = jax.random.normal(ks[4], (codebook_dim, dim), jnp.float32) * 0.1
        b_out = jax.random.normal(ks[5], (1, dim), jnp.float32) * 0.01
        params.append((w_in, b_in, emb, w_out, b_out))
    return tuple(params)


# TODO(synk): training-time paths (k-means init, EMA buffer updates, expired-code
# replacement, distributed broadcast, straight-through estimator, mse loss) are
# stateful / host-driven and are not part of this inference kernel.


if __name__ == "__main__":
    B, D, T = 2, 32, 8
    CODEBOOK_DIM = 16
    CODEBOOK_SIZE = 64
    NUM_Q = 4

    key = jax.random.PRNGKey(0)
    k_x, k_p = jax.random.split(key)
    x = jax.random.normal(k_x, (B, D, T), jnp.float32)   # [B, D, T] like PyTorch
    params = make_params(k_p, NUM_Q, D, CODEBOOK_DIM, CODEBOOK_SIZE)

    quantized, codes, losses, metrics = rvq_forward(x, params)
    jax.block_until_ready((quantized, codes, losses))

    assert quantized.shape == (B, D, T)
    assert codes.shape == (NUM_Q, B, T)
    assert losses.shape == (NUM_Q,)
    assert bool(jnp.isfinite(quantized).all())
    assert bool((codes >= 0).all()) and bool((codes < CODEBOOK_SIZE).all())

    # Cross-check: the kernel's dequantized sum must match decoding its own
    # codes with the same bf16 weights (gather -> project_out -> accumulate).
    flat_codes = codes.reshape(NUM_Q, B * T)
    recon = jnp.zeros((B * T, D), jnp.float32)
    for i, (w_in, b_in, emb, w_out, b_out) in enumerate(params):
        gathered = emb.astype(jnp.bfloat16)[flat_codes[i]]            # (N, Dc) bf16
        recon = recon + (jnp.dot(gathered, w_out.astype(jnp.bfloat16),
                                 preferred_element_type=jnp.float32)
                         + b_out.astype(jnp.float32))
    recon = jnp.transpose(recon.reshape(B, T, D), (0, 2, 1))
    assert bool(jnp.allclose(quantized, recon, rtol=1e-3, atol=1e-3))

    print("KERNEL_OK")
</pallas_src>

<mosaic_0001>
module attributes {stable_mosaic.version = 11 : i64} {
  func.func @_rvq_kernel(%arg0: i32, %arg1: i32, %arg2: memref<8x32xf32, #tpu.memory_space<vmem>>, %arg3: memref<4x32x16xbf16, #tpu.memory_space<vmem>>, %arg4: memref<4x1x16xf32, #tpu.memory_space<vmem>>, %arg5: memref<4x64x16xbf16, #tpu.memory_space<vmem>>, %arg6: memref<4x1x64xf32, #tpu.memory_space<vmem>>, %arg7: memref<4x16x32xbf16, #tpu.memory_space<vmem>>, %arg8: memref<4x1x32xf32, #tpu.memory_space<vmem>>, %arg9: memref<8x32xf32, #tpu.memory_space<vmem>>, %arg10: memref<1x8x4xi32, #tpu.memory_space<vmem>>, %arg11: memref<8x32xf32, #tpu.memory_space<vmem>>) attributes {dimension_semantics = [#tpu.dimension_semantics<parallel>, #tpu.dimension_semantics<arbitrary>], iteration_bounds = array<i64: 2, 1>, scalar_prefetch = 0 : i64, scratch_operands = 1 : i64, tpu.core_type = #tpu.core_type<tc>, window_params = [{transform_indices = @transform_0, window_bounds = array<i64: 8, 32>}, {transform_indices = @transform_1, window_bounds = array<i64: 4, 32, 16>}, {transform_indices = @transform_2, window_bounds = array<i64: 4, 1, 16>}, {transform_indices = @transform_3, window_bounds = array<i64: 4, 64, 16>}, {transform_indices = @transform_4, window_bounds = array<i64: 4, 1, 64>}, {transform_indices = @transform_5, window_bounds = array<i64: 4, 16, 32>}, {transform_indices = @transform_6, window_bounds = array<i64: 4, 1, 32>}, {transform_indices = @transform_7, window_bounds = array<i64: 8, 32>}, {transform_indices = @transform_8, window_bounds = array<i64: 1, 8, 4>}]} {
    %c0_i32 = arith.constant 0 : i32
    %0 = arith.cmpi eq, %arg1, %c0_i32 : i32
    %1 = arith.extui %0 : i1 to i32
    %c0_i32_0 = arith.constant 0 : i32
    %2 = arith.cmpi ne, %1, %c0_i32_0 : i32
    scf.if %2 {
      %c0_112 = arith.constant 0 : index
      %c0_113 = arith.constant 0 : index
      %201 = vector.load %arg2[%c0_112, %c0_113] : memref<8x32xf32, #tpu.memory_space<vmem>>, vector<8x32xf32>
      %c0_114 = arith.constant 0 : index
      %c0_115 = arith.constant 0 : index
      %202 = vector.load %arg11[%c0_114, %c0_115] : memref<8x32xf32, #tpu.memory_space<vmem>>, vector<8x32xf32>
      tpu.vector_store %arg11[%c0_114, %c0_115], %201 {strides = array<i32>} : memref<8x32xf32, #tpu.memory_space<vmem>>, vector<8x32xf32>,
      %cst_116 = arith.constant 0.000000e+00 : f32
      %203 = vector.broadcast %cst_116 : f32 to vector<8x32xf32>
      %c0_117 = arith.constant 0 : index
      %c0_118 = arith.constant 0 : index
      %204 = vector.load %arg9[%c0_117, %c0_118] : memref<8x32xf32, #tpu.memory_space<vmem>>, vector<8x32xf32>
      tpu.vector_store %arg9[%c0_117, %c0_118], %203 {strides = array<i32>} : memref<8x32xf32, #tpu.memory_space<vmem>>, vector<8x32xf32>,
    } else {
    }
    %3 = tpu.iota {dimensions = array<i32: 1>} : vector<8x64xi32>
    %4 = tpu.iota {dimensions = array<i32: 1>} : vector<8x4xi32>
    %c0 = arith.constant 0 : index
    %c0_1 = arith.constant 0 : index
    %5 = vector.load %arg11[%c0, %c0_1] : memref<8x32xf32, #tpu.memory_space<vmem>>, vector<8x32xf32>
    %c0_2 = arith.constant 0 : index
    %c0_3 = arith.constant 0 : index
    %6 = vector.load %arg9[%c0_2, %c0_3] : memref<8x32xf32, #tpu.memory_space<vmem>>, vector<8x32xf32>
    %c0_i32_4 = arith.constant 0 : i32
    %7 = vector.broadcast %c0_i32_4 : i32 to vector<8x4xi32>
    %c0_5 = arith.constant 0 : index
    %c0_6 = arith.constant 0 : index
    %c0_7 = arith.constant 0 : index
    %8 = vector.load %arg5[%c0_5, %c0_6, %c0_7] : memref<4x64x16xbf16, #tpu.memory_space<vmem>>, vector<1x64x16xbf16>
    %9 = vector.shape_cast %8 : vector<1x64x16xbf16> to vector<64x16xbf16>
    %10 = arith.truncf %5 : vector<8x32xf32> to vector<8x32xbf16>
    %c0_8 = arith.constant 0 : index
    %c0_9 = arith.constant 0 : index
    %c0_10 = arith.constant 0 : index
    %11 = vector.load %arg3[%c0_8, %c0_9, %c0_10] : memref<4x32x16xbf16, #tpu.memory_space<vmem>>, vector<1x32x16xbf16>
    %12 = vector.shape_cast %11 : vector<1x32x16xbf16> to vector<32x16xbf16>
    %cst = arith.constant dense<0.000000e+00> : vector<8x16xf32>
    %13 = tpu.matmul %10, %12, %cst {dimension_numbers = #tpu.dot_dimension_numbers<[1], [0], [0], [1], [0, 0, 1, 1], [], []>} : vector<8x32xbf16>, vector<32x16xbf16>, vector<8x16xf32> -> vector<8x16xf32>
    %c0_11 = arith.constant 0 : index
    %c0_12 = arith.constant 0 : index
    %c0_13 = arith.constant 0 : index
    %14 = vector.load %arg4[%c0_11, %c0_12, %c0_13] : memref<4x1x16xf32, #tpu.memory_space<vmem>>, vector<1x1x16xf32>
    %15 = vector.shape_cast %14 : vector<1x1x16xf32> to vector<1x16xf32>
    %16 = vector.broadcast %15 : vector<1x16xf32> to vector<8x16xf32>
    %17 = arith.addf %13, %16 : vector<8x16xf32>
    %18 = arith.truncf %17 : vector<8x16xf32> to vector<8x16xbf16>
    %cst_14 = arith.constant dense<0.000000e+00> : vector<8x64xf32>
    %19 = tpu.matmul %18, %9, %cst_14 {dimension_numbers = #tpu.dot_dimension_numbers<[1], [1], [0], [0], [0, 0, 1, 0], [], []>} : vector<8x16xbf16>, vector<64x16xbf16>, vector<8x64xf32> -> vector<8x64xf32>
    %c0_15 = arith.constant 0 : index
    %c0_16 = arith.constant 0 : index
    %c0_17 = arith.constant 0 : index
    %20 = vector.load %arg6[%c0_15, %c0_16, %c0_17] : memref<4x1x64xf32, #tpu.memory_space<vmem>>, vector<1x1x64xf32>
    %21 = vector.shape_cast %20 : vector<1x1x64xf32> to vector<1x64xf32>
    %cst_18 = arith.constant 2.000000e+00 : f32
    %22 = vector.broadcast %cst_18 : f32 to vector<8x64xf32>
    %23 = arith.mulf %22, %19 : vector<8x64xf32>
    %24 = vector.broadcast %21 : vector<1x64xf32> to vector<8x64xf32>
    %25 = arith.subf %24, %23 : vector<8x64xf32>
    %cst_19 = arith.constant dense<0x7F800000> : vector<8xf32>
    %26 = vector.multi_reduction <minimumf>, %25, %cst_19 [1] : vector<8x64xf32> to vector<8xf32>
    %27 = vector.shape_cast %26 : vector<8xf32> to vector<8x1xf32>
    %28 = vector.broadcast %27 : vector<8x1xf32> to vector<8x64xf32>
    %29 = arith.cmpf oeq, %25, %28 : vector<8x64xf32>
    %c2147483647_i32 = arith.constant 2147483647 : i32
    %30 = vector.broadcast %c2147483647_i32 : i32 to vector<8x64xi32>
    %31 = arith.select %29, %3, %30 : vector<8x64xi1>, vector<8x64xi32>
    %cst_20 = arith.constant dense<2147483647> : vector<8xi32>
    %32 = vector.multi_reduction <minsi>, %31, %cst_20 [1] : vector<8x64xi32> to vector<8xi32>
    %33 = vector.shape_cast %32 : vector<8xi32> to vector<8x1xi32>
    %34 = vector.broadcast %33 : vector<8x1xi32> to vector<8x64xi32>
    %35 = arith.cmpi eq, %34, %3 : vector<8x64xi32>
    %36 = arith.extui %35 : vector<8x64xi1> to vector<8x64xi32>
    %37 = arith.sitofp %36 : vector<8x64xi32> to vector<8x64xf32>
    %38 = arith.truncf %37 : vector<8x64xf32> to vector<8x64xbf16>
    %cst_21 = arith.constant dense<0.000000e+00> : vector<8x16xf32>
    %39 = tpu.matmul %38, %9, %cst_21 {dimension_numbers = #tpu.dot_dimension_numbers<[1], [0], [0], [1], [0, 0, 1, 1], [], []>} : vector<8x64xbf16>, vector<64x16xbf16>, vector<8x16xf32> -> vector<8x16xf32>
    %40 = arith.truncf %39 : vector<8x16xf32> to vector<8x16xbf16>
    %c0_22 = arith.constant 0 : index
    %c0_23 = arith.constant 0 : index
    %c0_24 = arith.constant 0 : index
    %41 = vector.load %arg7[%c0_22, %c0_23, %c0_24] : memref<4x16x32xbf16, #tpu.memory_space<vmem>>, vector<1x16x32xbf16>
    %42 = vector.shape_cast %41 : vector<1x16x32xbf16> to vector<16x32xbf16>
    %cst_25 = arith.constant dense<0.000000e+00> : vector<8x32xf32>
    %43 = tpu.matmul %40, %42, %cst_25 {dimension_numbers = #tpu.dot_dimension_numbers<[1], [0], [0], [1], [0, 0, 1, 1], [], []>} : vector<8x16xbf16>, vector<16x32xbf16>, vector<8x32xf32> -> vector<8x32xf32>
    %c0_26 = arith.constant 0 : index
    %c0_27 = arith.constant 0 : index
    %c0_28 = arith.constant 0 : index
    %44 = vector.load %arg8[%c0_26, %c0_27, %c0_28] : memref<4x1x32xf32, #tpu.memory_space<vmem>>, vector<1x1x32xf32>
    %45 = vector.shape_cast %44 : vector<1x1x32xf32> to vector<1x32xf32>
    %46 = vector.broadcast %45 : vector<1x32xf32> to vector<8x32xf32>
    %47 = arith.addf %43, %46 : vector<8x32xf32>
    %c0_i32_29 = arith.constant 0 : i32
    %48 = vector.broadcast %c0_i32_29 : i32 to vector<8x4xi32>
    %49 = arith.cmpi eq, %4, %48 : vector<8x4xi32>
    %50 = vector.shape_cast %33 : vector<8x1xi32> to vector<8x1xi32>
    %51 = vector.broadcast %50 : vector<8x1xi32> to vector<8x4xi32>
    %52 = arith.select %49, %51, %7 : vector<8x4xi1>, vector<8x4xi32>
    %53 = arith.subf %5, %47 : vector<8x32xf32>
    %54 = arith.addf %6, %47 : vector<8x32xf32>
    %c1 = arith.constant 1 : index
    %c0_30 = arith.constant 0 : index
    %c0_31 = arith.constant 0 : index
    %55 = vector.load %arg5[%c1, %c0_30, %c0_31] : memref<4x64x16xbf16, #tpu.memory_space<vmem>>, vector<1x64x16xbf16>
    %56 = vector.shape_cast %55 : vector<1x64x16xbf16> to vector<64x16xbf16>
    %57 = arith.truncf %53 : vector<8x32xf32> to vector<8x32xbf16>
    %c1_32 = arith.constant 1 : index
    %c0_33 = arith.constant 0 : index
    %c0_34 = arith.constant 0 : index
    %58 = vector.load %arg3[%c1_32, %c0_33, %c0_34] : memref<4x32x16xbf16, #tpu.memory_space<vmem>>, vector<1x32x16xbf16>
    %59 = vector.shape_cast %58 : vector<1x32x16xbf16> to vector<32x16xbf16>
    %cst_35 = arith.constant dense<0.000000e+00> : vector<8x16xf32>
    %60 = tpu.matmul %57, %59, %cst_35 {dimension_numbers = #tpu.dot_dimension_numbers<[1], [0], [0], [1], [0, 0, 1, 1], [], []>} : vector<8x32xbf16>, vector<32x16xbf16>, vector<8x16xf32> -> vector<8x16xf32>
    %c1_36 = arith.constant 1 : index
    %c0_37 = arith.constant 0 : index
    %c0_38 = arith.constant 0 : index
    %61 = vector.load %arg4[%c1_36, %c0_37, %c0_38] : memref<4x1x16xf32, #tpu.memory_space<vmem>>, vector<1x1x16xf32>
    %62 = vector.shape_cast %61 : vector<1x1x16xf32> to vector<1x16xf32>
    %63 = vector.broadcast %62 : vector<1x16xf32> to vector<8x16xf32>
    %64 = arith.addf %60, %63 : vector<8x16xf32>
    %65 = arith.truncf %64 : vector<8x16xf32> to vector<8x16xbf16>
    %cst_39 = arith.constant dense<0.000000e+00> : vector<8x64xf32>
    %66 = tpu.matmul %65, %56, %cst_39 {dimension_numbers = #tpu.dot_dimension_numbers<[1], [1], [0], [0], [0, 0, 1, 0], [], []>} : vector<8x16xbf16>, vector<64x16xbf16>, vector<8x64xf32> -> vector<8x64xf32>
    %c1_40 = arith.constant 1 : index
    %c0_41 = arith.constant 0 : index
    %c0_42 = arith.constant 0 : index
    %67 = vector.load %arg6[%c1_40, %c0_41, %c0_42] : memref<4x1x64xf32, #tpu.memory_space<vmem>>, vector<1x1x64xf32>
    %68 = vector.shape_cast %67 : vector<1x1x64xf32> to vector<1x64xf32>
    %cst_43 = arith.constant 2.000000e+00 : f32
    %69 = vector.broadcast %cst_43 : f32 to vector<8x64xf32>
    %70 = arith.mulf %69, %66 : vector<8x64xf32>
    %71 = vector.broadcast %68 : vector<1x64xf32> to vector<8x64xf32>
    %72 = arith.subf %71, %70 : vector<8x64xf32>
    %cst_44 = arith.constant dense<0x7F800000> : vector<8xf32>
    %73 = vector.multi_reduction <minimumf>, %72, %cst_44 [1] : vector<8x64xf32> to vector<8xf32>
    %74 = vector.shape_cast %73 : vector<8xf32> to vector<8x1xf32>
    %75 = vector.broadcast %74 : vector<8x1xf32> to vector<8x64xf32>
    %76 = arith.cmpf oeq, %72, %75 : vector<8x64xf32>
    %c2147483647_i32_45 = arith.constant 2147483647 : i32
    %77 = vector.broadcast %c2147483647_i32_45 : i32 to vector<8x64xi32>
    %78 = arith.select %76, %3, %77 : vector<8x64xi1>, vector<8x64xi32>
    %cst_46 = arith.constant dense<2147483647> : vector<8xi32>
    %79 = vector.multi_reduction <minsi>, %78, %cst_46 [1] : vector<8x64xi32> to vector<8xi32>
    %80 = vector.shape_cast %79 : vector<8xi32> to vector<8x1xi32>
    %81 = vector.broadcast %80 : vector<8x1xi32> to vector<8x64xi32>
    %82 = arith.cmpi eq, %81, %3 : vector<8x64xi32>
    %83 = arith.extui %82 : vector<8x64xi1> to vector<8x64xi32>
    %84 = arith.sitofp %83 : vector<8x64xi32> to vector<8x64xf32>
    %85 = arith.truncf %84 : vector<8x64xf32> to vector<8x64xbf16>
    %cst_47 = arith.constant dense<0.000000e+00> : vector<8x16xf32>
    %86 = tpu.matmul %85, %56, %cst_47 {dimension_numbers = #tpu.dot_dimension_numbers<[1], [0], [0], [1], [0, 0, 1, 1], [], []>} : vector<8x64xbf16>, vector<64x16xbf16>, vector<8x16xf32> -> vector<8x16xf32>
    %87 = arith.truncf %86 : vector<8x16xf32> to vector<8x16xbf16>
    %c1_48 = arith.constant 1 : index
    %c0_49 = arith.constant 0 : index
    %c0_50 = arith.constant 0 : index
    %88 = vector.load %arg7[%c1_48, %c0_49, %c0_50] : memref<4x16x32xbf16, #tpu.memory_space<vmem>>, vector<1x16x32xbf16>
    %89 = vector.shape_cast %88 : vector<1x16x32xbf16> to vector<16x32xbf16>
    %cst_51 = arith.constant dense<0.000000e+00> : vector<8x32xf32>
    %90 = tpu.matmul %87, %89, %cst_51 {dimension_numbers = #tpu.dot_dimension_numbers<[1], [0], [0], [1], [0, 0, 1, 1], [], []>} : vector<8x16xbf16>, vector<16x32xbf16>, vector<8x32xf32> -> vector<8x32xf32>
    %c1_52 = arith.constant 1 : index
    %c0_53 = arith.constant 0 : index
    %c0_54 = arith.constant 0 : index
    %91 = vector.load %arg8[%c1_52, %c0_53, %c0_54] : memref<4x1x32xf32, #tpu.memory_space<vmem>>, vector<1x1x32xf32>
    %92 = vector.shape_cast %91 : vector<1x1x32xf32> to vector<1x32xf32>
    %93 = vector.broadcast %92 : vector<1x32xf32> to vector<8x32xf32>
    %94 = arith.addf %90, %93 : vector<8x32xf32>
    %c1_i32 = arith.constant 1 : i32
    %95 = vector.broadcast %c1_i32 : i32 to vector<8x4xi32>
    %96 = arith.cmpi eq, %4, %95 : vector<8x4xi32>
    %97 = vector.shape_cast %80 : vector<8x1xi32> to vector<8x1xi32>
    %98 = vector.broadcast %97 : vector<8x1xi32> to vector<8x4xi32>
    %99 = arith.select %96, %98, %52 : vector<8x4xi1>, vector<8x4xi32>
    %100 = arith.subf %53, %94 : vector<8x32xf32>
    %101 = arith.addf %54, %94 : vector<8x32xf32>
    %c2 = arith.constant 2 : index
    %c0_55 = arith.constant 0 : index
    %c0_56 = arith.constant 0 : index
    %102 = vector.load %arg5[%c2, %c0_55, %c0_56] : memref<4x64x16xbf16, #tpu.memory_space<vmem>>, vector<1x64x16xbf16>
    %103 = vector.shape_cast %102 : vector<1x64x16xbf16> to vector<64x16xbf16>
    %104 = arith.truncf %100 : vector<8x32xf32> to vector<8x32xbf16>
    %c2_57 = arith.constant 2 : index
    %c0_58 = arith.constant 0 : index
    %c0_59 = arith.constant 0 : index
    %105 = vector.load %arg3[%c2_57, %c0_58, %c0_59] : memref<4x32x16xbf16, #tpu.memory_space<vmem>>, vector<1x32x16xbf16>
    %106 = vector.shape_cast %105 : vector<1x32x16xbf16> to vector<32x16xbf16>
    %cst_60 = arith.constant dense<0.000000e+00> : vector<8x16xf32>
    %107 = tpu.matmul %104, %106, %cst_60 {dimension_numbers = #tpu.dot_dimension_numbers<[1], [0], [0], [1], [0, 0, 1, 1], [], []>} : vector<8x32xbf16>, vector<32x16xbf16>, vector<8x16xf32> -> vector<8x16xf32>
    %c2_61 = arith.constant 2 : index
    %c0_62 = arith.constant 0 : index
    %c0_63 = arith.constant 0 : index
    %108 = vector.load %arg4[%c2_61, %c0_62, %c0_63] : memref<4x1x16xf32, #tpu.memory_space<vmem>>, vector<1x1x16xf32>
    %109 = vector.shape_cast %108 : vector<1x1x16xf32> to vector<1x16xf32>
    %110 = vector.broadcast %109 : vector<1x16xf32> to vector<8x16xf32>
    %111 = arith.addf %107, %110 : vector<8x16xf32>
    %112 = arith.truncf %111 : vector<8x16xf32> to vector<8x16xbf16>
    %cst_64 = arith.constant dense<0.000000e+00> : vector<8x64xf32>
    %113 = tpu.matmul %112, %103, %cst_64 {dimension_numbers = #tpu.dot_dimension_numbers<[1], [1], [0], [0], [0, 0, 1, 0], [], []>} : vector<8x16xbf16>, vector<64x16xbf16>, vector<8x64xf32> -> vector<8x64xf32>
    %c2_65 = arith.constant 2 : index
    %c0_66 = arith.constant 0 : index
    %c0_67 = arith.constant 0 : index
    %114 = vector.load %arg6[%c2_65, %c0_66, %c0_67] : memref<4x1x64xf32, #tpu.memory_space<vmem>>, vector<1x1x64xf32>
    %115 = vector.shape_cast %114 : vector<1x1x64xf32> to vector<1x64xf32>
    %cst_68 = arith.constant 2.000000e+00 : f32
    %116 = vector.broadcast %cst_68 : f32 to vector<8x64xf32>
    %117 = arith.mulf %116, %113 : vector<8x64xf32>
    %118 = vector.broadcast %115 : vector<1x64xf32> to vector<8x64xf32>
    %119 = arith.subf %118, %117 : vector<8x64xf32>
    %cst_69 = arith.constant dense<0x7F800000> : vector<8xf32>
    %120 = vector.multi_reduction <minimumf>, %119, %cst_69 [1] : vector<8x64xf32> to vector<8xf32>
    %121 = vector.shape_cast %120 : vector<8xf32> to vector<8x1xf32>
    %122 = vector.broadcast %121 : vector<8x1xf32> to vector<8x64xf32>
    %123 = arith.cmpf oeq, %119, %122 : vector<8x64xf32>
    %c2147483647_i32_70 = arith.constant 2147483647 : i32
    %124 = vector.broadcast %c2147483647_i32_70 : i32 to vector<8x64xi32>
    %125 = arith.select %123, %3, %124 : vector<8x64xi1>, vector<8x64xi32>
    %cst_71 = arith.constant dense<2147483647> : vector<8xi32>
    %126 = vector.multi_reduction <minsi>, %125, %cst_71 [1] : vector<8x64xi32> to vector<8xi32>
    %127 = vector.shape_cast %126 : vector<8xi32> to vector<8x1xi32>
    %128 = vector.broadcast %127 : vector<8x1xi32> to vector<8x64xi32>
    %129 = arith.cmpi eq, %128, %3 : vector<8x64xi32>
    %130 = arith.extui %129 : vector<8x64xi1> to vector<8x64xi32>
    %131 = arith.sitofp %130 : vector<8x64xi32> to vector<8x64xf32>
    %132 = arith.truncf %131 : vector<8x64xf32> to vector<8x64xbf16>
    %cst_72 = arith.constant dense<0.000000e+00> : vector<8x16xf32>
    %133 = tpu.matmul %132, %103, %cst_72 {dimension_numbers = #tpu.dot_dimension_numbers<[1], [0], [0], [1], [0, 0, 1, 1], [], []>} : vector<8x64xbf16>, vector<64x16xbf16>, vector<8x16xf32> -> vector<8x16xf32>
    %134 = arith.truncf %133 : vector<8x16xf32> to vector<8x16xbf16>
    %c2_73 = arith.constant 2 : index
    %c0_74 = arith.constant 0 : index
    %c0_75 = arith.constant 0 : index
    %135 = vector.load %arg7[%c2_73, %c0_74, %c0_75] : memref<4x16x32xbf16, #tpu.memory_space<vmem>>, vector<1x16x32xbf16>
    %136 = vector.shape_cast %135 : vector<1x16x32xbf16> to vector<16x32xbf16>
    %cst_76 = arith.constant dense<0.000000e+00> : vector<8x32xf32>
    %137 = tpu.matmul %134, %136, %cst_76 {dimension_numbers = #tpu.dot_dimension_numbers<[1], [0], [0], [1], [0, 0, 1, 1], [], []>} : vector<8x16xbf16>, vector<16x32xbf16>, vector<8x32xf32> -> vector<8x32xf32>
    %c2_77 = arith.constant 2 : index
    %c0_78 = arith.constant 0 : index
    %c0_79 = arith.constant 0 : index
    %138 = vector.load %arg8[%c2_77, %c0_78, %c0_79] : memref<4x1x32xf32, #tpu.memory_space<vmem>>, vector<1x1x32xf32>
    %139 = vector.shape_cast %138 : vector<1x1x32xf32> to vector<1x32xf32>
    %140 = vector.broadcast %139 : vector<1x32xf32> to vector<8x32xf32>
    %141 = arith.addf %137, %140 : vector<8x32xf32>
    %c2_i32 = arith.constant 2 : i32
    %142 = vector.broadcast %c2_i32 : i32 to vector<8x4xi32>
    %143 = arith.cmpi eq, %4, %142 : vector<8x4xi32>
    %144 = vector.shape_cast %127 : vector<8x1xi32> to vector<8x1xi32>
    %145 = vector.broadcast %144 : vector<8x1xi32> to vector<8x4xi32>
    %146 = arith.select %143, %145, %99 : vector<8x4xi1>, vector<8x4xi32>
    %147 = arith.subf %100, %141 : vector<8x32xf32>
    %148 = arith.addf %101, %141 : vector<8x32xf32>
    %c3 = arith.constant 3 : index
    %c0_80 = arith.constant 0 : index
    %c0_81 = arith.constant 0 : index
    %149 = vector.load %arg5[%c3, %c0_80, %c0_81] : memref<4x64x16xbf16, #tpu.memory_space<vmem>>, vector<1x64x16xbf16>
    %150 = vector.shape_cast %149 : vector<1x64x16xbf16> to vector<64x16xbf16>
    %151 = arith.truncf %147 : vector<8x32xf32> to vector<8x32xbf16>
    %c3_82 = arith.constant 3 : index
    %c0_83 = arith.constant 0 : index
    %c0_84 = arith.constant 0 : index
    %152 = vector.load %arg3[%c3_82, %c0_83, %c0_84] : memref<4x32x16xbf16, #tpu.memory_space<vmem>>, vector<1x32x16xbf16>
    %153 = vector.shape_cast %152 : vector<1x32x16xbf16> to vector<32x16xbf16>
    %cst_85 = arith.constant dense<0.000000e+00> : vector<8x16xf32>
    %154 = tpu.matmul %151, %153, %cst_85 {dimension_numbers = #tpu.dot_dimension_numbers<[1], [0], [0], [1], [0, 0, 1, 1], [], []>} : vector<8x32xbf16>, vector<32x16xbf16>, vector<8x16xf32> -> vector<8x16xf32>
    %c3_86 = arith.constant 3 : index
    %c0_87 = arith.constant 0 : index
    %c0_88 = arith.constant 0 : index
    %155 = vector.load %arg4[%c3_86, %c0_87, %c0_88] : memref<4x1x16xf32, #tpu.memory_space<vmem>>, vector<1x1x16xf32>
    %156 = vector.shape_cast %155 : vector<1x1x16xf32> to vector<1x16xf32>
    %157 = vector.broadcast %156 : vector<1x16xf32> to vector<8x16xf32>
    %158 = arith.addf %154, %157 : vector<8x16xf32>
    %159 = arith.truncf %158 : vector<8x16xf32> to vector<8x16xbf16>
    %cst_89 = arith.constant dense<0.000000e+00> : vector<8x64xf32>
    %160 = tpu.matmul %159, %150, %cst_89 {dimension_numbers = #tpu.dot_dimension_numbers<[1], [1], [0], [0], [0, 0, 1, 0], [], []>} : vector<8x16xbf16>, vector<64x16xbf16>, vector<8x64xf32> -> vector<8x64xf32>
    %c3_90 = arith.constant 3 : index
    %c0_91 = arith.constant 0 : index
    %c0_92 = arith.constant 0 : index
    %161 = vector.load %arg6[%c3_90, %c0_91, %c0_92] : memref<4x1x64xf32, #tpu.memory_space<vmem>>, vector<1x1x64xf32>
    %162 = vector.shape_cast %161 : vector<1x1x64xf32> to vector<1x64xf32>
    %cst_93 = arith.constant 2.000000e+00 : f32
    %163 = vector.broadcast %cst_93 : f32 to vector<8x64xf32>
    %164 = arith.mulf %163, %160 : vector<8x64xf32>
    %165 = vector.broadcast %162 : vector<1x64xf32> to vector<8x64xf32>
    %166 = arith.subf %165, %164 : vector<8x64xf32>
    %cst_94 = arith.constant dense<0x7F800000> : vector<8xf32>
    %167 = vector.multi_reduction <minimumf>, %166, %cst_94 [1] : vector<8x64xf32> to vector<8xf32>
    %168 = vector.shape_cast %167 : vector<8xf32> to vector<8x1xf32>
    %169 = vector.broadcast %168 : vector<8x1xf32> to vector<8x64xf32>
    %170 = arith.cmpf oeq, %166, %169 : vector<8x64xf32>
    %c2147483647_i32_95 = arith.constant 2147483647 : i32
    %171 = vector.broadcast %c2147483647_i32_95 : i32 to vector<8x64xi32>
    %172 = arith.select %170, %3, %171 : vector<8x64xi1>, vector<8x64xi32>
    %cst_96 = arith.constant dense<2147483647> : vector<8xi32>
    %173 = vector.multi_reduction <minsi>, %172, %cst_96 [1] : vector<8x64xi32> to vector<8xi32>
    %174 = vector.shape_cast %173 : vector<8xi32> to vector<8x1xi32>
    %175 = vector.broadcast %174 : vector<8x1xi32> to vector<8x64xi32>
    %176 = arith.cmpi eq, %175, %3 : vector<8x64xi32>
    %177 = arith.extui %176 : vector<8x64xi1> to vector<8x64xi32>
    %178 = arith.sitofp %177 : vector<8x64xi32> to vector<8x64xf32>
    %179 = arith.truncf %178 : vector<8x64xf32> to vector<8x64xbf16>
    %cst_97 = arith.constant dense<0.000000e+00> : vector<8x16xf32>
    %180 = tpu.matmul %179, %150, %cst_97 {dimension_numbers = #tpu.dot_dimension_numbers<[1], [0], [0], [1], [0, 0, 1, 1], [], []>} : vector<8x64xbf16>, vector<64x16xbf16>, vector<8x16xf32> -> vector<8x16xf32>
    %181 = arith.truncf %180 : vector<8x16xf32> to vector<8x16xbf16>
    %c3_98 = arith.constant 3 : index
    %c0_99 = arith.constant 0 : index
    %c0_100 = arith.constant 0 : index
    %182 = vector.load %arg7[%c3_98, %c0_99, %c0_100] : memref<4x16x32xbf16, #tpu.memory_space<vmem>>, vector<1x16x32xbf16>
    %183 = vector.shape_cast %182 : vector<1x16x32xbf16> to vector<16x32xbf16>
    %cst_101 = arith.constant dense<0.000000e+00> : vector<8x32xf32>
    %184 = tpu.matmul %181, %183, %cst_101 {dimension_numbers = #tpu.dot_dimension_numbers<[1], [0], [0], [1], [0, 0, 1, 1], [], []>} : vector<8x16xbf16>, vector<16x32xbf16>, vector<8x32xf32> -> vector<8x32xf32>
    %c3_102 = arith.constant 3 : index
    %c0_103 = arith.constant 0 : index
    %c0_104 = arith.constant 0 : index
    %185 = vector.load %arg8[%c3_102, %c0_103, %c0_104] : memref<4x1x32xf32, #tpu.memory_space<vmem>>, vector<1x1x32xf32>
    %186 = vector.shape_cast %185 : vector<1x1x32xf32> to vector<1x32xf32>
    %187 = vector.broadcast %186 : vector<1x32xf32> to vector<8x32xf32>
    %188 = arith.addf %184, %187 : vector<8x32xf32>
    %c3_i32 = arith.constant 3 : i32
    %189 = vector.broadcast %c3_i32 : i32 to vector<8x4xi32>
    %190 = arith.cmpi eq, %4, %189 : vector<8x4xi32>
    %191 = vector.shape_cast %174 : vector<8x1xi32> to vector<8x1xi32>
    %192 = vector.broadcast %191 : vector<8x1xi32> to vector<8x4xi32>
    %193 = arith.select %190, %192, %146 : vector<8x4xi1>, vector<8x4xi32>
    %194 = arith.subf %147, %188 : vector<8x32xf32>
    %195 = arith.addf %148, %188 : vector<8x32xf32>
    %c0_105 = arith.constant 0 : index
    %c0_106 = arith.constant 0 : index
    %196 = vector.load %arg11[%c0_105, %c0_106] : memref<8x32xf32, #tpu.memory_space<vmem>>, vector<8x32xf32>
    tpu.vector_store %arg11[%c0_105, %c0_106], %194 {strides = array<i32>} : memref<8x32xf32, #tpu.memory_space<vmem>>, vector<8x32xf32>,
    %c0_107 = arith.constant 0 : index
    %c0_108 = arith.constant 0 : index
    %197 = vector.load %arg9[%c0_107, %c0_108] : memref<8x32xf32, #tpu.memory_space<vmem>>, vector<8x32xf32>
    tpu.vector_store %arg9[%c0_107, %c0_108], %195 {strides = array<i32>} : memref<8x32xf32, #tpu.memory_space<vmem>>, vector<8x32xf32>,
    %c0_109 = arith.constant 0 : index
    %c0_110 = arith.constant 0 : index
    %c0_111 = arith.constant 0 : index
    %198 = vector.load %arg10[%c0_109, %c0_110, %c0_111] : memref<1x8x4xi32, #tpu.memory_space<vmem>>, vector<1x8x4xi32>
    %199 = vector.shape_cast %198 : vector<1x8x4xi32> to vector<8x4xi32>
    %200 = vector.shape_cast %193 : vector<8x4xi32> to vector<1x8x4xi32>
    tpu.vector_store %arg10[%c0_109, %c0_110, %c0_111], %200 {strides = array<i32>} : memref<1x8x4xi32, #tpu.memory_space<vmem>>, vector<1x8x4xi32>,
    return
  }
  func.func @transform_0(%arg0: i32, %arg1: i32) -> (i32, i32) {
    %c0_i32 = arith.constant 0 : i32
    %c0_i32_0 = arith.constant 0 : i32
    return %arg0, %c0_i32 : i32, i32
  }
  func.func @transform_1(%arg0: i32, %arg1: i32) -> (i32, i32, i32) {
    %c0_i32 = arith.constant 0 : i32
    %c0_i32_0 = arith.constant 0 : i32
    %c0_i32_1 = arith.constant 0 : i32
    return %arg1, %c0_i32, %c0_i32_0 : i32, i32, i32
  }
  func.func @transform_2(%arg0: i32, %arg1: i32) -> (i32, i32, i32) {
    %c0_i32 = arith.constant 0 : i32
    %c0_i32_0 = arith.constant 0 : i32
    %c0_i32_1 = arith.constant 0 : i32
    return %arg1, %c0_i32, %c0_i32_0 : i32, i32, i32
  }
  func.func @transform_3(%arg0: i32, %arg1: i32) -> (i32, i32, i32) {
    %c0_i32 = arith.constant 0 : i32
    %c0_i32_0 = arith.constant 0 : i32
    %c0_i32_1 = arith.constant 0 : i32
    return %arg1, %c0_i32, %c0_i32_0 : i32, i32, i32
  }
  func.func @transform_4(%arg0: i32, %arg1: i32) -> (i32, i32, i32) {
    %c0_i32 = arith.constant 0 : i32
    %c0_i32_0 = arith.constant 0 : i32
    %c0_i32_1 = arith.constant 0 : i32
    return %arg1, %c0_i32, %c0_i32_0 : i32, i32, i32
  }
  func.func @transform_5(%arg0: i32, %arg1: i32) -> (i32, i32, i32) {
    %c0_i32 = arith.constant 0 : i32
    %c0_i32_0 = arith.constant 0 : i32
    %c0_i32_1 = arith.constant 0 : i32
    return %arg1, %c0_i32, %c0_i32_0 : i32, i32, i32
  }
  func.func @transform_6(%arg0: i32, %arg1: i32) -> (i32, i32, i32) {
    %c0_i32 = arith.constant 0 : i32
    %c0_i32_0 = arith.constant 0 : i32
    %c0_i32_1 = arith.constant 0 : i32
    return %arg1, %c0_i32, %c0_i32_0 : i32, i32, i32
  }
  func.func @transform_7(%arg0: i32, %arg1: i32) -> (i32, i32) {
    %c0_i32 = arith.constant 0 : i32
    %c0_i32_0 = arith.constant 0 : i32
    return %arg0, %c0_i32 : i32, i32
  }
  func.func @transform_8(%arg0: i32, %arg1: i32) -> (i32, i32, i32) {
    %c0_i32 = arith.constant 0 : i32
    %c0_i32_0 = arith.constant 0 : i32
    return %arg1, %arg0, %c0_i32 : i32, i32, i32
  }
}

</mosaic_0001>

<bundles_post_ra>
// kernel: rvq_forward.1
= control target key start
LH: loop header
LB: loop body
LE: loop exit
PB: predicated region body
PF: predicated region fallthrough
CT: control target
= control target key end

     0   :  { %14 = vsyncpa [#allocation4], 0  ;;  %s2874_s0 = inlined_call_operand.vmem [shape: f32[16,32], index: 0, kind: input, shape index: {}]   ;;  %s2875_s1 = inlined_call_operand.vmem [shape: bf16[4,32,16], index: 1, kind: input, shape index: {}]   ;;  %s2876_s2 = inlined_call_operand.vmem [shape: f32[4,1,16], index: 2, kind: input, shape index: {}]   ;;  %s2877_s3 = inlined_call_operand.vmem [shape: bf16[4,64,16], index: 3, kind: input, shape index: {}]   ;;  %s2878_s4 = inlined_call_operand.vmem [shape: f32[4,1,64], index: 4, kind: input, shape index: {}]   ;;  %s2879_s5 = inlined_call_operand.vmem [shape: bf16[4,16,32], index: 5, kind: input, shape index: {}]   ;;  %s2880_s6 = inlined_call_operand.vmem [shape: f32[4,1,32], index: 6, kind: input, shape index: {}]   ;;  %s2881_s7 = inlined_call_operand.hbm [shape: f32[16,32], index: 7, kind: output, shape index: {0}]   ;;  %s2882_s8 = inlined_call_operand.vmem [shape: s32[1,16,4], index: 8, kind: output, shape index: {1}]  }
   0x1   :  { %16 = vsyncpa [#allocation4 + $0x1], 0  ;;  %s2443_s27 = smov 0   ;;  %s2445_s28 = smov 0  }
   0x2   :  { %s2447_s29 = smov 0   ;;  %s2449_s30 = smov 0  }
   0x3   :  { %s2451_s9 = smov 0   ;;  %s2453_s10 = smov 0  }
   0x4 LB: > { %s1889_s11 = sadd.s32 4294967295, %s2393_s10   ;;  %s1890_s12 = sadd.s32 4294967294, %s2393_s10   ;;  %s2393_s10 = sphi %s2453_s10, %s22_s10   ;;  %s2389_s9 = sphi %s2451_s9, %s2889_s9   ;;  %s2385_s30 = sphi %s2449_s30, %s2888_s30   ;;  %s2381_s29 = sphi %s2447_s29, %s2887_s29   ;;  %s2377_s28 = sphi %s2445_s28, %s2886_s28   ;;  %s2373_s27 = sphi %s2443_s27, %s2885_s27  }
   0x5   : > { %s34_s13 = sadd.s32 1, %s2389_s9  ;;  %s223_s14 = sadd.s32 1, %s2381_s29 }
   0x6   : > { %p36_p0 = scmp.ge.s32.totalorder %s34_s13, 2  ;;  %p233_p1 = scmp.ne.s32.totalorder %s2381_s29, %s2377_s28 }
   0x7   : > { %p234_p2 = scmp.eq.s32.totalorder %s1889_s11, 1  ;;  %p239_p3 = scmp.ne.s32.totalorder %s2377_s28, %s2373_s27 }
   0x8   : > { %s2891_s13 = smov (%p36_p0, %s34_s13), 0  ;;  %p240_p5 = scmp.eq.s32.totalorder %s1890_s12, 1 }
   0x9   : > { %p2483_p4 = por %p234_p2, %p233_p1  ;;  %s220_s16 = ssub.s32 %s2389_s9, %s2891_s13 }
   0xa   : > { %p1899_p6 = scmp.ge.s32.totalorder %s2393_s10, 1  ;;  %p221_p7 = scmp.eq.s32.totalorder %s220_s16, 0 }
   0xb   : > { %p2490_p8 = por %p240_p5, %p239_p3  ;;  %p347_p9 = scmp.lt.s32.totalorder %s2393_s10, 3 }
   0xc   : > { %s2496_s18 = scalar_select %p221_p7, %s2381_s29, %s223_s14  }
   0xd   : > { %p348_p10 = pnand %p1899_p6, %p347_p9 }
   0xe   : > { %v2287_v0 = vld [vmem:[%s2875_s1] sm:$0xff] (!%p348_p10)   ;;  %v2395_v1 = vmov (!%p348_p10), 0.0   ;;  %v2288_v2 = vld [vmem:[%s2875_s1 + $0x8] sm:$0xff] (!%p348_p10)   ;;  %vm2396_vm0 = vmmov (!%p348_p10), 0   ;;  %p418_p11 = scmp.lt.s32.totalorder (!%p348_p10), %s2385_s30, 1  ;;  %vm576_vm1 = vcmask (!%p348_p10), 130048   ;;  %v475_v29 = vlaneseq (!%p348_p10) }
   0xf   : > { %351 = sbr.rel (%p348_p10) target bundleno = 5281 (0x14a1), region = 48  ;;  %2078 = vmatprep.subr.bf16.mxu0 (!%p348_p10), %v2395_v1  ;;  %2086 = vmatprep.subr.bf16.mxu1 (!%p348_p10), %v2395_v1  ;;  %v2289_v3 = vld [vmem:[%s2877_s3] sm:$0xff] (!%p348_p10)   ;;  %v2290_v4 = vld [vmem:[%s2877_s3 + $0x8] sm:$0xff] (!%p348_p10)   ;;  %vm472_vm2 = vcmask (!%p348_p10), 261120   ;;  %v2291_v8 = vld [vmem:[%s2877_s3 + $0x10] sm:$0xff] (!%p348_p10)   ;;  %vm641_vm3 = vcmask (!%p348_p10), 523264  }
  0x10   : > { %2079 = vmatpush3.bf16.msra.mxu0 (!%p348_p10), %v2287_v0  ;;  %2082 = vmatprep.mubr.msk.bf16.mxu0 (!%p348_p10), %vm2396_vm0, %v2395_v1  ;;  %v581_v5 = vsel (!%p348_p10), %vm576_vm1, %v2289_v3, 0  ;;  %v584_v7 = vsel (!%p348_p10), %vm576_vm1, %v2290_v4, 0  ;;  %v587_v10 = vsel (!%p348_p10), %vm576_vm1, %v2291_v8, 0  ;;  %v2292_v12 = vld [vmem:[%s2877_s3 + $0x18] sm:$0xff] (!%p348_p10)   ;;  %v1903_v14 = vld [vmem:[%s2876_s2] ss:$0 sm:$0xff] (!%p348_p10) }
  0x11   : > { %2080 = vmatprep.subr.bf16.mxu0 (!%p348_p10), %v2395_v1  ;;  %2094 = vmatprep.mubr.msk.bf16.mxu1 (!%p348_p10), %vm2396_vm0, %v2395_v1  ;;  %v590_v13 = vsel (!%p348_p10), %vm576_vm1, %v2292_v12, 0  ;;  %v1912_v22 = vld [vmem:[%s2878_s4] ss:$0 sm:$0xff] (!%p348_p10)  ;;  %v2564_v30 = vand.u32 (!%p348_p10), 127, %v475_v29  ;;  %s405_s20 = sand.u32 (!%p348_p10), 1, %s2377_s28   ;;  %v2294_v49 = vld [vmem:[%s2875_s1 + $0x10] sm:$0xff] (!%p348_p10)  }
  0x12   : > { %2087 = vmatpush3.bf16.xpose.msra.mxu1 (!%p348_p10), %v581_v5  ;;  %v2293_v46 = vld [vmem:[%s2879_s5] sm:$0xff] (!%p348_p10)   ;;  %s1900_s21 = sshll.u32 (!%p348_p10), %s405_s20, 3  ;;  %v2295_v54 = vld [vmem:[%s2875_s1 + $0x18] sm:$0xff] (!%p348_p10)   ;;  %v2297_v57 = vld [vmem:[%s2877_s3 + $0x28] sm:$0xff] (!%p348_p10)   ;;  %s2397_s16 = smov (!%p348_p10), [#allocation3]  }
  0x13   : > { %2088 = vmatprep.subr.bf16.mxu1 (!%p348_p10), %v2395_v1  ;;  %s2583_s22 = scalar_lea.vmem (!%p348_p10), [#allocation3], %s1900_s21  ;;  %v2296_v55 = vld [vmem:[%s2877_s3 + $0x20] sm:$0xff] (!%p348_p10)   ;;  %v882_v58 = vsel (!%p348_p10), %vm576_vm1, %v2297_v57, 0  ;;  %v2298_v59 = vld [vmem:[%s2877_s3 + $0x30] sm:$0xff] (!%p348_p10)   ;;  %v2299_v61 = vld [vmem:[%s2877_s3 + $0x38] sm:$0xff] (!%p348_p10)   ;;  %vm772_vm9 = vcmp.eq.s32.totalorder (!%p348_p10), %v2564_v30, 0 }
  0x14   : > { %2081 = vmatpush3.bf16.msra.mxu0 (!%p348_p10), %v2288_v2  ;;  %474 = vst.msk [vmem:[%s2583_s22] sm:$0xff] (!%p348_p10), %vm472_vm2, %v2395_v1  ;;  %v879_v56 = vsel (!%p348_p10), %vm576_vm1, %v2296_v55, 0  ;;  %v885_v60 = vsel (!%p348_p10), %vm576_vm1, %v2298_v59, 0  ;;  %v888_v62 = vsel (!%p348_p10), %vm576_vm1, %v2299_v61, 0  ;;  %v1915_v63 = vld [vmem:[%s2880_s6] ss:$0 sm:$0xff] (!%p348_p10) }
  0x15   : > { %2098 = vmatprep.subr.bf16.mxu0 (!%p348_p10), %v2395_v1  ;;  %vm1072_vm10 = vcmp.eq.s32.totalorder (!%p348_p10), %v2564_v30, 1  ;;  %vm1372_vm14 = vcmp.eq.s32.totalorder (!%p348_p10), %v2564_v30, 2  ;;  %s2015_s21 = sshll.u32 (!%p348_p10), %s2385_s30, 7  ;;  %s1702_s23 = sshll.u32 (!%p348_p10), %s2583_s22, 4  ;;  %s2824_s23 = int_to_ptr.vmem [resolvable:$true] %s1702_s23 }
  0x16   : > { %s2516_s25 = scalar_select %p418_p11, %s2385_s30, 1 }
  0x17   : > { %s2822_s11 = scalar_lea.hbm %s2881_s7, %s2015_s21  ;;  %s1681_s30 = scalar_lea.sflag [#allocation4], %s405_s20 }
  0x18   : > { %s1901_s12 = sshll.u32 %s2516_s25, 3 }
  0x19   : > { %s421_s19 = scalar_lea.vmem %s2874_s0, %s1901_s12  ;;  %s465_s14 = scalar_lea.vmem %s2882_s8, %s1901_s12 }
  0x1a   : > { %v471_v6 = vld [vmem:[%s421_s19] sm:$0xff]  ;;  %2089 = vmatpush3.bf16.xpose.msra.mxu1 %v584_v7  ;;  %s2319_s19 = sshll.u32 %s2397_s16, 4  ;;  %s2320_s19 = int_to_ptr.vmem [resolvable:$false] %s2319_s19 }
  0x1b   : > { %473 = vst.msk [vmem:[#allocation2] sm:$0xff] %vm472_vm2, %v471_v6  ;;  %2090 = vmatprep.subr.bf16.mxu1 %v2395_v1  ;;  %s2321_s25 = scalar_lea.vmem %s2320_s19, 256  ;;  %p2322_p1 = scmp.lt.s32.totalorder %s2824_s23, %s2320_s19 }
  0x22   : > { %v2536_v9 = vld [vmem:[#allocation2] sm:$0xff]  ;;  %2091 = vmatpush3.bf16.xpose.msra.mxu1 %v587_v10 }
  0x23   : > { %v487_v11 = vpack.c.bf16 %v2536_v9, %v2536_v9  ;;  %2092 = vmatprep.subr.bf16.mxu1 %v2395_v1 }
  0x25   : > { %2083 = vmatmul.mubr.msk.bf16.vlgmr.msra.gmra.mrb[0].mxu0 %vm472_vm2, %v487_v11 }
  0x26   : > { %2099 = vmatpush3.bf16.msra.mxu0 %v2289_v3  ;;  %2106 = vmatprep.mubr.msk.bf16.mxu0 %vm2396_vm0, %v2395_v1 }
  0x27   : > { %2100 = vmatprep.subr.bf16.mxu0 %v2395_v1 }
  0x2a   : > { %2101 = vmatpush3.bf16.msra.mxu0 %v2290_v4  ;;  %2093 = vmatpush3.bf16.xpose.msra.mxu1 %v590_v13 }
  0x2b   : > { %2102 = vmatprep.subr.bf16.mxu0 %v2395_v1  ;;  %2124 = vmatprep.subr.bf16.mxu1 %v2395_v1 }
  0x2e   : > { %2103 = vmatpush3.bf16.msra.mxu0 %v2291_v8  ;;  %v1931_v8 = vld [vmem:[%s2876_s2 + $0x1] ss:$0 sm:$0xff] }
  0x2f   : > { %2104 = vmatprep.subr.bf16.mxu0 %v2395_v1 }
  0x32   : > { %2105 = vmatpush3.bf16.msra.mxu0 %v2292_v12 }
  0x33   : > { %2110 = vmatprep.subr.bf16.mxu0 %v2395_v1 }
  0xf8   : > { %v549_v15 = vpop.f32.mrb[0].mxu0 }
  0xf9   : > { %v550_v16 = vadd.f32 %v1903_v14, %v549_v15  ;;  %v2084_v17 = vpop.f32.mrb[1].mxu0 }
  0xfa   : > { %v552_v18 = vpop.f32.mrb[2].mxu0 }
  0xfb   : > { %v555_v19 = vpack.c.bf16 %v550_v16, %v550_v16  ;;  %v2085_v20 = vpop.f32.mrb[3].mxu0  ;;  %v1941_v16 = vld [vmem:[%s2878_s4 + $0x1] ss:$0 sm:$0xff] }
  0xfd   : > { %2095 = vmatmul.mubr.msk.bf16.vlgmr.msra.gmra.mrb[0].mxu1 %vm576_vm1, %v555_v19 }
  0xfe   : > { %2132 = vmatprep.mubr.msk.bf16.mxu1 %vm2396_vm0, %v2395_v1  ;;  %2125 = vmatpush3.bf16.xpose.msra.mxu1 %v879_v56  ;;  %v2306_v56 = vld [vmem:[%s2877_s3 + $0x58] sm:$0xff]  }
  0xff   : > { %2126 = vmatprep.subr.bf16.mxu1 %v2395_v1 }
 0x106   : > { %2127 = vmatpush3.bf16.xpose.msra.mxu1 %v882_v58  ;;  %v478_v58 = vld [vmem:[%s2583_s22] sm:$0xff] }
 0x107   : > { %2128 = vmatprep.subr.bf16.mxu1 %v2395_v1 }
 0x10e   : > { %2129 = vmatpush3.bf16.xpose.msra.mxu1 %v885_v60 }
 0x10f   : > { %2130 = vmatprep.subr.bf16.mxu1 %v2395_v1 }
 0x116   : > { %2131 = vmatpush3.bf16.xpose.msra.mxu1 %v888_v62 }
 0x117   : > { %2162 = vmatprep.subr.bf16.mxu1 %v2395_v1 }
 0x1d0   : > { %v626_v21 = vpop.f32.mrb[0].mxu1 }
 0x1d1   : > { %v633_v23 = vmul.f32 2.0, %v626_v21  ;;  %v2096_v24 = vpop.f32.mrb[1].mxu1 }
 0x1d2   : > { %v629_v25 = vpop.f32.mrb[2].mxu1 }
 0x1d3   : > { %v2097_v26 = vpop.f32.mrb[3].mxu1  ;;  %v640_v27 = vsub.f32 %v1912_v22, %v633_v23 }
 0x1d5   : > { %v642_v28 = vsel %vm641_vm3, %v640_v27, inf }
 0x1d6   : > { %643 = vmin.xlane.f32.xlu0 %v642_v28 }
 0x263   : > { %v644_v31 = vpop.xlane.xlu0 %643 }
 0x264   : > { %vm645_vm4 = vcmp.eq.f32.partialorder %v640_v27, %v644_v31 }
 0x265   : > { %v646_v32 = vsel %vm645_vm4, %v2564_v30, 2147483647 }
 0x266   : > { %v647_v33 = vsel %vm641_vm3, %v646_v32, 2147483647 }
 0x267   : > { %v649_v34 = vshra.s32 %v647_v33, 16  ;;  %v648_v36 = vand.u32 65535, %v647_v33 }
 0x269   : > { %v651_v35 = vcvt.s32.f32 %v649_v34  ;;  %v650_v38 = vcvt.s32.f32 %v648_v36 }
 0x26b   : > { %652 = vmin.xlane.f32.xlu0 %v651_v35 }
 0x2f8   : > { %v653_v37 = vpop.xlane.xlu0 %652 }
 0x2f9   : > { %vm654_vm5 = vcmp.eq.f32.partialorder %v651_v35, %v653_v37  ;;  %v659_v40 = vcvt.f32.s32 %v653_v37 }
 0x2fa   : > { %v655_v39 = vsel %vm654_vm5, %v650_v38, inf }
 0x2fb   : > { %656 = vmin.xlane.f32.xlu1 %v655_v39  ;;  %v660_v42 = vshll.u32 %v659_v40, 16 }
 0x388   : > { %v657_v41 = vpop.xlane.xlu1 %656 }
 0x389   : > { %v658_v43 = vcvt.f32.s32 %v657_v41  ;;  %v2300_v41 = vld [vmem:[%s2879_s5 + $0x8] sm:$0xff]  }
 0x38b   : > { %v2568_v44 = vadd.s32 %v660_v42, %v658_v43 }
 0x38d   : > { %vm662_vm6 = vcmp.eq.s32.totalorder %v2568_v44, %v2564_v30  ;;  %v773_v38 = vsel %vm772_vm9, %v2568_v44, 0  ;;  %v2301_v44 = vld [vmem:[%s2875_s1 + $0x20] sm:$0xff]  }
 0x38e   : > { %v1913_v45 = vsel %vm662_vm6, 1.0, %v2395_v1  ;;  %vm1672_vm6 = vcmp.eq.s32.totalorder %v2564_v30, 3 }
 0x38f   : > { %v665_v47 = vpack.c.bf16 %v1913_v45, %v1913_v45 }
 0x391   : > { %2107 = vmatmul.mubr.msk.bf16.vlgmr.msra.gmra.mrb[4].mxu0 %vm641_vm3, %v665_v47 }
 0x392   : > { %2111 = vmatpush3.bf16.msra.mxu0 %v2293_v46  ;;  %2112 = vmatprep.mubr.msk.bf16.mxu0 %vm2396_vm0, %v2395_v1 }
 0x393   : > { %2116 = vmatprep.subr.bf16.mxu0 %v2395_v1 }
 0x464   : > { %v707_v48 = vpop.f32.mrb[4].mxu0 }
 0x465   : > { %v713_v50 = vpack.c.bf16 %v707_v48, %v707_v48  ;;  %v2108_v51 = vpop.f32.mrb[5].mxu0 }
 0x466   : > { %v710_v52 = vpop.f32.mrb[6].mxu0 }
 0x467   : > { %v2109_v53 = vpop.f32.mrb[7].mxu0  ;;  %2113 = vmatmul.mubr.msk.bf16.vlgmr.msra.gmra.mrb[8].mxu0 %vm576_vm1, %v713_v50  ;;  %v2303_v50 = vld [vmem:[%s2877_s3 + $0x40] sm:$0xff]   ;;  %v2304_v52 = vld [vmem:[%s2877_s3 + $0x48] sm:$0xff]  }
 0x468   : > { %2117 = vmatpush3.bf16.msra.mxu0 %v2294_v49  ;;  %2120 = vmatprep.mubr.msk.bf16.mxu0 %vm2396_vm0, %v2395_v1  ;;  %v2302_v49 = vld [vmem:[%s2875_s1 + $0x28] sm:$0xff]   ;;  %v1179_v51 = vsel %vm576_vm1, %v2303_v50, 0  ;;  %v1182_v53 = vsel %vm576_vm1, %v2304_v52, 0 }
 0x469   : > { %2118 = vmatprep.subr.bf16.mxu0 %v2395_v1 }
 0x46c   : > { %2119 = vmatpush3.bf16.msra.mxu0 %v2295_v54  ;;  %v2305_v54 = vld [vmem:[%s2877_s3 + $0x50] sm:$0xff]  }
 0x46d   : > { %2136 = vmatprep.subr.bf16.mxu0 %v2395_v1 }
 0x53a   : > { %v766_v0 = vpop.f32.mrb[8].mxu0 }
 0x53b   : > { %v2622_v2 = vadd.f32 %v1915_v63, %v766_v0  ;;  %v2114_v3 = vpop.f32.mrb[9].mxu0 }
 0x53c   : > { %v769_v4 = vpop.f32.mrb[10].mxu0 }
 0x53d   : > { %v2626_v5 = vsub.f32 %v2536_v9, %v2622_v2  ;;  %v2115_v6 = vpop.f32.mrb[11].mxu0 }
 0x53f   : > { %v785_v7 = vpack.c.bf16 %v2626_v5, %v2626_v5 }
 0x541   : > { %2121 = vmatmul.mubr.msk.bf16.vlgmr.msra.gmra.mrb[12].mxu0 %vm472_vm2, %v785_v7 }
 0x542   : > { %2137 = vmatpush3.bf16.msra.mxu0 %v2296_v55  ;;  %2144 = vmatprep.mubr.msk.bf16.mxu0 %vm2396_vm0, %v2395_v1  ;;  %v1185_v55 = vsel %vm576_vm1, %v2305_v54, 0 }
 0x543   : > { %2138 = vmatprep.subr.bf16.mxu0 %v2395_v1 }
 0x546   : > { %2139 = vmatpush3.bf16.msra.mxu0 %v2297_v57  ;;  %v1188_v57 = vsel %vm576_vm1, %v2306_v56, 0 }
 0x547   : > { %2140 = vmatprep.subr.bf16.mxu0 %v2395_v1 }
 0x54a   : > { %2141 = vmatpush3.bf16.msra.mxu0 %v2298_v59  ;;  %v1947_v59 = vld [vmem:[%s2880_s6 + $0x1] ss:$0 sm:$0xff] }
 0x54b   : > { %2142 = vmatprep.subr.bf16.mxu0 %v2395_v1 }
 0x54e   : > { %2143 = vmatpush3.bf16.msra.mxu0 %v2299_v61  ;;  %v775_v61 = vadd.f32 %v2622_v2, %v478_v58  ;;  %v1963_v2 = vld [vmem:[%s2876_s2 + $0x2] ss:$0 sm:$0xff] }
 0x54f   : > { %2148 = vmatprep.subr.bf16.mxu0 %v2395_v1 }
 0x614   : > { %v848_v9 = vpop.f32.mrb[12].mxu0 }
 0x615   : > { %v849_v10 = vadd.f32 %v1931_v8, %v848_v9  ;;  %v2122_v11 = vpop.f32.mrb[13].mxu0 }
 0x616   : > { %v851_v12 = vpop.f32.mrb[14].mxu0 }
 0x617   : > { %v854_v13 = vpack.c.bf16 %v849_v10, %v849_v10  ;;  %v2123_v14 = vpop.f32.mrb[15].mxu0 }
 0x618   : > { %v1973_v14 = vld [vmem:[%s2878_s4 + $0x2] ss:$0 sm:$0xff] }
 0x619   : > { %2133 = vmatmul.mubr.msk.bf16.vlgmr.msra.gmra.mrb[4].mxu1 %vm576_vm1, %v854_v13 }
 0x61a   : > { %2170 = vmatprep.mubr.msk.bf16.mxu1 %vm2396_vm0, %v2395_v1  ;;  %2163 = vmatpush3.bf16.xpose.msra.mxu1 %v1179_v51  ;;  %v2312_v51 = vld [vmem:[%s2877_s3 + $0x70] sm:$0xff]  }
 0x61b   : > { %2164 = vmatprep.subr.bf16.mxu1 %v2395_v1 }
 0x622   : > { %2165 = vmatpush3.bf16.xpose.msra.mxu1 %v1182_v53  ;;  %v2313_v53 = vld [vmem:[%s2877_s3 + $0x78] sm:$0xff]  }
 0x623   : > { %2166 = vmatprep.subr.bf16.mxu1 %v2395_v1 }
 0x62a   : > { %2167 = vmatpush3.bf16.xpose.msra.mxu1 %v1185_v55  ;;  %v1979_v55 = vld [vmem:[%s2880_s6 + $0x2] ss:$0 sm:$0xff] }
 0x62b   : > { %2168 = vmatprep.subr.bf16.mxu1 %v2395_v1 }
 0x632   : > { %2169 = vmatpush3.bf16.xpose.msra.mxu1 %v1188_v57 }
 0x633   : > { %2200 = vmatprep.subr.bf16.mxu1 %v2395_v1 }
 0x6ec   : > { %v924_v15 = vpop.f32.mrb[4].mxu1 }
 0x6ed   : > { %v932_v17 = vmul.f32 2.0, %v924_v15  ;;  %v2134_v18 = vpop.f32.mrb[5].mxu1 }
 0x6ee   : > { %v927_v19 = vpop.f32.mrb[6].mxu1 }
 0x6ef   : > { %v2135_v20 = vpop.f32.mrb[7].mxu1  ;;  %v939_v21 = vsub.f32 %v1941_v16, %v932_v17 }
 0x6f1   : > { %v940_v22 = vsel %vm641_vm3, %v939_v21, inf }
 0x6f2   : > { %941 = vmin.xlane.f32.xlu1 %v940_v22 }
 0x77f   : > { %v942_v23 = vpop.xlane.xlu1 %941 }
 0x780   : > { %vm943_vm7 = vcmp.eq.f32.partialorder %v939_v21, %v942_v23 }
 0x781   : > { %v944_v24 = vsel %vm943_vm7, %v2564_v30, 2147483647  ;;  %vm1678_vm7 = vcmask 31744  }
 0x782   : > { %v945_v25 = vsel %vm641_vm3, %v944_v24, 2147483647 }
 0x783   : > { %v947_v26 = vshra.s32 %v945_v25, 16  ;;  %v946_v28 = vand.u32 65535, %v945_v25 }
 0x785   : > { %v949_v27 = vcvt.s32.f32 %v947_v26  ;;  %v948_v31 = vcvt.s32.f32 %v946_v28 }
 0x787   : > { %950 = vmin.xlane.f32.xlu0 %v949_v27 }
 0x814   : > { %v951_v29 = vpop.xlane.xlu0 %950 }
 0x815   : > { %vm952_vm8 = vcmp.eq.f32.partialorder %v949_v27, %v951_v29  ;;  %v957_v33 = vcvt.f32.s32 %v951_v29 }
 0x816   : > { %v953_v32 = vsel %vm952_vm8, %v948_v31, inf }
 0x817   : > { %954 = vmin.xlane.f32.xlu1 %v953_v32  ;;  %v958_v35 = vshll.u32 %v957_v33, 16 }
 0x8a4   : > { %v955_v34 = vpop.xlane.xlu1 %954 }
 0x8a5   : > { %v956_v36 = vcvt.f32.s32 %v955_v34 }
 0x8a7   : > { %v959_v37 = vadd.s32 %v958_v35, %v956_v36 }
 0x8a9   : > { %vm960_vm11 = vcmp.eq.s32.totalorder %v959_v37, %v2564_v30  ;;  %v2653_v39 = vsel %vm1072_vm10, %v959_v37, %v773_v38  ;;  %v2307_v38 = vld [vmem:[%s2879_s5 + $0x10] sm:$0xff]  }
 0x8aa   : > { %v1942_v40 = vsel %vm960_vm11, 1.0, %v2395_v1 }
 0x8ab   : > { %v963_v42 = vpack.c.bf16 %v1942_v40, %v1942_v40 }
 0x8ad   : > { %2145 = vmatmul.mubr.msk.bf16.vlgmr.msra.gmra.mrb[16].mxu0 %vm641_vm3, %v963_v42 }
 0x8ae   : > { %2149 = vmatpush3.bf16.msra.mxu0 %v2300_v41  ;;  %2150 = vmatprep.mubr.msk.bf16.mxu0 %vm2396_vm0, %v2395_v1 }
 0x8af   : > { %2154 = vmatprep.subr.bf16.mxu0 %v2395_v1 }
 0x980   : > { %v1005_v43 = vpop.f32.mrb[16].mxu0 }
 0x981   : > { %v1011_v45 = vpack.c.bf16 %v1005_v43, %v1005_v43  ;;  %v2146_v46 = vpop.f32.mrb[17].mxu0 }
 0x982   : > { %v1008_v47 = vpop.f32.mrb[18].mxu0  ;;  %v2309_v46 = vld [vmem:[%s2875_s1 + $0x38] sm:$0xff]  }
 0x983   : > { %v2147_v48 = vpop.f32.mrb[19].mxu0  ;;  %2151 = vmatmul.mubr.msk.bf16.vlgmr.msra.gmra.mrb[20].mxu0 %vm576_vm1, %v1011_v45  ;;  %v2310_v47 = vld [vmem:[%s2877_s3 + $0x60] sm:$0xff]  }
 0x984   : > { %2155 = vmatpush3.bf16.msra.mxu0 %v2301_v44  ;;  %2158 = vmatprep.mubr.msk.bf16.mxu0 %vm2396_vm0, %v2395_v1  ;;  %v1479_v48 = vsel %vm576_vm1, %v2310_v47, 0 }
 0x985   : > { %2156 = vmatprep.subr.bf16.mxu0 %v2395_v1 }
 0x988   : > { %2157 = vmatpush3.bf16.msra.mxu0 %v2302_v49  ;;  %v2311_v49 = vld [vmem:[%s2877_s3 + $0x68] sm:$0xff]  }
 0x989   : > { %2174 = vmatprep.subr.bf16.mxu0 %v2395_v1 }
 0xa56   : > { %v1066_v60 = vpop.f32.mrb[20].mxu0 }
 0xa57   : > { %v1067_v62 = vadd.f32 %v1947_v59, %v1066_v60  ;;  %v2152_v63 = vpop.f32.mrb[21].mxu0 }
 0xa58   : > { %v1069_v0 = vpop.f32.mrb[22].mxu0 }
 0xa59   : > { %v2700_v3 = vsub.f32 %v2626_v5, %v1067_v62  ;;  %v2702_v4 = vadd.f32 %v1067_v62, %v775_v61  ;;  %v2153_v6 = vpop.f32.mrb[23].mxu0  ;;  %v1995_v0 = vld [vmem:[%s2876_s2 + $0x3] ss:$0 sm:$0xff] }
 0xa5b   : > { %v1085_v7 = vpack.c.bf16 %v2700_v3, %v2700_v3 }
 0xa5d   : > { %2159 = vmatmul.mubr.msk.bf16.vlgmr.msra.gmra.mrb[24].mxu0 %vm472_vm2, %v1085_v7 }
 0xa5e   : > { %2175 = vmatpush3.bf16.msra.mxu0 %v2303_v50  ;;  %2182 = vmatprep.mubr.msk.bf16.mxu0 %vm2396_vm0, %v2395_v1  ;;  %v1482_v50 = vsel %vm576_vm1, %v2311_v49, 0 }
 0xa5f   : > { %2176 = vmatprep.subr.bf16.mxu0 %v2395_v1 }
 0xa62   : > { %2177 = vmatpush3.bf16.msra.mxu0 %v2304_v52  ;;  %v1485_v52 = vsel %vm576_vm1, %v2312_v51, 0 }
 0xa63   : > { %2178 = vmatprep.subr.bf16.mxu0 %v2395_v1 }
 0xa66   : > { %2179 = vmatpush3.bf16.msra.mxu0 %v2305_v54  ;;  %v1488_v54 = vsel %vm576_vm1, %v2313_v53, 0 }
 0xa67   : > { %2180 = vmatprep.subr.bf16.mxu0 %v2395_v1 }
 0xa6a   : > { %2181 = vmatpush3.bf16.msra.mxu0 %v2306_v56 }
 0xa6b   : > { %2186 = vmatprep.subr.bf16.mxu0 %v2395_v1 }
 0xb30   : > { %v1148_v5 = vpop.f32.mrb[24].mxu0 }
 0xb31   : > { %v1149_v8 = vadd.f32 %v1963_v2, %v1148_v5  ;;  %v2160_v9 = vpop.f32.mrb[25].mxu0 }
 0xb32   : > { %v1151_v10 = vpop.f32.mrb[26].mxu0  ;;  %v2005_v9 = vld [vmem:[%s2878_s4 + $0x3] ss:$0 sm:$0xff] }
 0xb33   : > { %v1154_v11 = vpack.c.bf16 %v1149_v8, %v1149_v8  ;;  %v2161_v12 = vpop.f32.mrb[27].mxu0 }
 0xb35   : > { %2171 = vmatmul.mubr.msk.bf16.vlgmr.msra.gmra.mrb[8].mxu1 %vm576_vm1, %v1154_v11 }
 0xb36   : > { %2208 = vmatprep.mubr.msk.bf16.mxu1 %vm2396_vm0, %v2395_v1  ;;  %2201 = vmatpush3.bf16.xpose.msra.mxu1 %v1479_v48 }
 0xb37   : > { %2202 = vmatprep.subr.bf16.mxu1 %v2395_v1 }
 0xb3e   : > { %2203 = vmatpush3.bf16.xpose.msra.mxu1 %v1482_v50 }
 0xb3f   : > { %2204 = vmatprep.subr.bf16.mxu1 %v2395_v1 }
 0xb46   : > { %2205 = vmatpush3.bf16.xpose.msra.mxu1 %v1485_v52 }
 0xb47   : > { %2206 = vmatprep.subr.bf16.mxu1 %v2395_v1 }
 0xb4e   : > { %2207 = vmatpush3.bf16.xpose.msra.mxu1 %v1488_v54 }
 0xc08   : > { %v1224_v13 = vpop.f32.mrb[8].mxu1 }
 0xc09   : > { %v1232_v15 = vmul.f32 2.0, %v1224_v13  ;;  %v2172_v16 = vpop.f32.mrb[9].mxu1 }
 0xc0a   : > { %v1227_v17 = vpop.f32.mrb[10].mxu1 }
 0xc0b   : > { %v2173_v18 = vpop.f32.mrb[11].mxu1  ;;  %v1239_v19 = vsub.f32 %v1973_v14, %v1232_v15 }
 0xc0d   : > { %v1240_v20 = vsel %vm641_vm3, %v1239_v19, inf }
 0xc0e   : > { %1241 = vmin.xlane.f32.xlu0 %v1240_v20 }
 0xc9b   : > { %v1242_v21 = vpop.xlane.xlu0 %1241 }
 0xc9c   : > { %vm1243_vm12 = vcmp.eq.f32.partialorder %v1239_v19, %v1242_v21 }
 0xc9d   : > { %v1244_v22 = vsel %vm1243_vm12, %v2564_v30, 2147483647 }
 0xc9e   : > { %v1245_v23 = vsel %vm641_vm3, %v1244_v22, 2147483647 }
 0xc9f   : > { %v1247_v24 = vshra.s32 %v1245_v23, 16  ;;  %v1246_v26 = vand.u32 65535, %v1245_v23 }
 0xca1   : > { %v1249_v25 = vcvt.s32.f32 %v1247_v24  ;;  %v1248_v28 = vcvt.s32.f32 %v1246_v26 }
 0xca3   : > { %1250 = vmin.xlane.f32.xlu1 %v1249_v25 }
 0xd30   : > { %v1251_v27 = vpop.xlane.xlu1 %1250 }
 0xd31   : > { %vm1252_vm13 = vcmp.eq.f32.partialorder %v1249_v25, %v1251_v27  ;;  %v1257_v31 = vcvt.f32.s32 %v1251_v27 }
 0xd32   : > { %v1253_v29 = vsel %vm1252_vm13, %v1248_v28, inf }
 0xd33   : > { %1254 = vmin.xlane.f32.xlu0 %v1253_v29  ;;  %v1258_v33 = vshll.u32 %v1257_v31, 16 }
 0xdc0   : > { %v1255_v32 = vpop.xlane.xlu0 %1254 }
 0xdc1   : > { %v1256_v34 = vcvt.f32.s32 %v1255_v32 }
 0xdc3   : > { %v1259_v35 = vadd.s32 %v1258_v33, %v1256_v34  ;;  %v2314_v33 = vld [vmem:[%s2879_s5 + $0x18] sm:$0xff]  }
 0xdc5   : > { %vm1260_vm15 = vcmp.eq.s32.totalorder %v1259_v35, %v2564_v30  ;;  %v2728_v36 = vsel %vm1372_vm14, %v1259_v35, %v2653_v39  ;;  %v2308_v39 = vld [vmem:[%s2875_s1 + $0x30] sm:$0xff]  }
 0xdc6   : > { %v1974_v37 = vsel %vm1260_vm15, 1.0, %v2395_v1 }
 0xdc7   : > { %v1263_v40 = vpack.c.bf16 %v1974_v37, %v1974_v37 }
 0xdc9   : > { %2183 = vmatmul.mubr.msk.bf16.vlgmr.msra.gmra.mrb[28].mxu0 %vm641_vm3, %v1263_v40  ;;  %v2011_v40 = vld [vmem:[%s2880_s6 + $0x3] ss:$0 sm:$0xff] }
 0xdca   : > { %2187 = vmatpush3.bf16.msra.mxu0 %v2307_v38  ;;  %2188 = vmatprep.mubr.msk.bf16.mxu0 %vm2396_vm0, %v2395_v1 }
 0xdcb   : > { %2192 = vmatprep.subr.bf16.mxu0 %v2395_v1 }
 0xe9c   : > { %v1305_v41 = vpop.f32.mrb[28].mxu0 }
 0xe9d   : > { %v1311_v42 = vpack.c.bf16 %v1305_v41, %v1305_v41  ;;  %v2184_v43 = vpop.f32.mrb[29].mxu0 }
 0xe9e   : > { %v1308_v44 = vpop.f32.mrb[30].mxu0 }
 0xe9f   : > { %v2185_v45 = vpop.f32.mrb[31].mxu0  ;;  %2189 = vmatmul.mubr.msk.bf16.vlgmr.msra.gmra.mrb[32].mxu0 %vm576_vm1, %v1311_v42 }
 0xea0   : > { %2193 = vmatpush3.bf16.msra.mxu0 %v2308_v39  ;;  %2196 = vmatprep.mubr.msk.bf16.mxu0 %vm2396_vm0, %v2395_v1 }
 0xea1   : > { %2194 = vmatprep.subr.bf16.mxu0 %v2395_v1 }
 0xea4   : > { %2195 = vmatpush3.bf16.msra.mxu0 %v2309_v46 }
 0xea5   : > { %2212 = vmatprep.subr.bf16.mxu0 %v2395_v1 }
 0xf72   : > { %v1366_v56 = vpop.f32.mrb[32].mxu0 }
 0xf73   : > { %v1367_v57 = vadd.f32 %v1979_v55, %v1366_v56  ;;  %v2190_v58 = vpop.f32.mrb[33].mxu0 }
 0xf74   : > { %v1369_v59 = vpop.f32.mrb[34].mxu0 }
 0xf75   : > { %v2772_v60 = vsub.f32 %v2700_v3, %v1367_v57  ;;  %v2775_v61 = vadd.f32 %v1367_v57, %v2702_v4  ;;  %v2191_v62 = vpop.f32.mrb[35].mxu0 }
 0xf77   : > { %v1385_v63 = vpack.c.bf16 %v2772_v60, %v2772_v60 }
 0xf79   : > { %2197 = vmatmul.mubr.msk.bf16.vlgmr.msra.gmra.mrb[36].mxu0 %vm472_vm2, %v1385_v63 }
 0xf7a   : > { %2213 = vmatpush3.bf16.msra.mxu0 %v2310_v47  ;;  %2220 = vmatprep.mubr.msk.bf16.mxu0 %vm2396_vm0, %v2395_v1 }
 0xf7b   : > { %2214 = vmatprep.subr.bf16.mxu0 %v2395_v1 }
 0xf7e   : > { %2215 = vmatpush3.bf16.msra.mxu0 %v2311_v49 }
 0xf7f   : > { %2216 = vmatprep.subr.bf16.mxu0 %v2395_v1 }
 0xf82   : > { %2217 = vmatpush3.bf16.msra.mxu0 %v2312_v51 }
 0xf83   : > { %2218 = vmatprep.subr.bf16.mxu0 %v2395_v1 }
 0xf86   : > { %2219 = vmatpush3.bf16.msra.mxu0 %v2313_v53 }
 0xf87   : > { %2224 = vmatprep.subr.bf16.mxu0 %v2395_v1 }
0x104c   : > { %v1448_v3 = vpop.f32.mrb[36].mxu0 }
0x104d   : > { %v1449_v4 = vadd.f32 %v1995_v0, %v1448_v3  ;;  %v2198_v6 = vpop.f32.mrb[37].mxu0 }
0x104e   : > { %v1451_v7 = vpop.f32.mrb[38].mxu0 }
0x104f   : > { %v1454_v2 = vpack.c.bf16 %v1449_v4, %v1449_v4  ;;  %v2199_v5 = vpop.f32.mrb[39].mxu0 }
0x1051   : > { %2209 = vmatmul.mubr.msk.bf16.vlgmr.msra.gmra.mrb[12].mxu1 %vm576_vm1, %v1454_v2 }
0x1124   : > { %v1524_v8 = vpop.f32.mrb[12].mxu1 }
0x1125   : > { %v1532_v10 = vmul.f32 2.0, %v1524_v8  ;;  %v2210_v11 = vpop.f32.mrb[13].mxu1 }
0x1126   : > { %v1527_v12 = vpop.f32.mrb[14].mxu1 }
0x1127   : > { %v2211_v13 = vpop.f32.mrb[15].mxu1  ;;  %v1539_v14 = vsub.f32 %v2005_v9, %v1532_v10 }
0x1129   : > { %v1540_v15 = vsel %vm641_vm3, %v1539_v14, inf }
0x112a   : > { %1541 = vmin.xlane.f32.xlu1 %v1540_v15 }
0x11b7   : > { %v1542_v16 = vpop.xlane.xlu1 %1541 }
0x11b8   : > { %vm1543_vm4 = vcmp.eq.f32.partialorder %v1539_v14, %v1542_v16 }
0x11b9   : > { %v1544_v17 = vsel %vm1543_vm4, %v2564_v30, 2147483647 }
0x11ba   : > { %v1545_v18 = vsel %vm641_vm3, %v1544_v17, 2147483647 }
0x11bb   : > { %v1547_v19 = vshra.s32 %v1545_v18, 16  ;;  %v1546_v21 = vand.u32 65535, %v1545_v18 }
0x11bd   : > { %v1549_v20 = vcvt.s32.f32 %v1547_v19  ;;  %v1548_v23 = vcvt.s32.f32 %v1546_v21 }
0x11bf   : > { %1550 = vmin.xlane.f32.xlu0 %v1549_v20 }
0x124c   : > { %v1551_v22 = vpop.xlane.xlu0 %1550 }
0x124d   : > { %vm1552_vm5 = vcmp.eq.f32.partialorder %v1549_v20, %v1551_v22  ;;  %v1557_v25 = vcvt.f32.s32 %v1551_v22 }
0x124e   : > { %v1553_v24 = vsel %vm1552_vm5, %v1548_v23, inf }
0x124f   : > { %1554 = vmin.xlane.f32.xlu1 %v1553_v24  ;;  %v1558_v27 = vshll.u32 %v1557_v25, 16 }
0x12dc   : > { %v1555_v26 = vpop.xlane.xlu1 %1554 }
0x12dd   : > { %v1556_v28 = vcvt.f32.s32 %v1555_v26 }
0x12df   : > { %v1559_v29 = vadd.s32 %v1558_v27, %v1556_v28 }
0x12e1   : > { %vm1560_vm8 = vcmp.eq.s32.totalorder %v1559_v29, %v2564_v30  ;;  %v1673_v31 = vsel %vm1672_vm6, %v1559_v29, %v2728_v36 }
0x12e2   : > { %v2006_v32 = vsel %vm1560_vm8, 1.0, %v2395_v1  ;;  %1679 = vst.msk [vmem:[%s465_s14] sm:$0xff] %vm1678_vm7, %v1673_v31  ;;  %s2315_s14 = scalar_lea.vmem %s2824_s23, 128 }
0x12e3   : > { %v1563_v34 = vpack.c.bf16 %v2006_v32, %v2006_v32  ;;  %p2316_p12 = scmp.ne.s32.totalorder %s2824_s23, %s2315_s14  ;;  %p2323_p2 = scmp.lt.s32.totalorder %s2321_s25, %s2315_s14 }
0x12e5   : > { %2221 = vmatmul.mubr.msk.bf16.vlgmr.msra.gmra.mrb[40].mxu0 %vm641_vm3, %v1563_v34  ;;  %p2317_p13 = pnand %p2316_p12, %p2483_p4  ;;  %p2324_p3 = por %p2323_p2, %p2322_p1 }
0x12e6   : > { %2225 = vmatpush3.bf16.msra.mxu0 %v2314_v33  ;;  %2226 = vmatprep.mubr.msk.bf16.mxu0 %vm2396_vm0, %v2395_v1 }
0x12e7   : > { %p2318_p0 = pneg %p2317_p13 }
0x12e9   : > { %p2325_p5 = pnand %p2324_p3, %p2318_p0 }
0x13b8   : > { %v1605_v35 = vpop.f32.mrb[40].mxu0 }
0x13b9   : > { %v1611_v30 = vpack.c.bf16 %v1605_v35, %v1605_v35  ;;  %v2222_v37 = vpop.f32.mrb[41].mxu0 }
0x13ba   : > { %v1608_v36 = vpop.f32.mrb[42].mxu0 }
0x13bb   : > { %v2223_v38 = vpop.f32.mrb[43].mxu0  ;;  %2227 = vmatmul.mubr.msk.bf16.vlgmr.msra.gmra.mrb[44].mxu0 %vm576_vm1, %v1611_v30 }
0x148e   : > { %v1666_v41 = vpop.f32.mrb[44].mxu0 }
0x148f   : > { %v1667_v39 = vadd.f32 %v2011_v40, %v1666_v41  ;;  %v2228_v42 = vpop.f32.mrb[45].mxu0 }
0x1490   : > { %v1669_v1 = vpop.f32.mrb[46].mxu0 }
0x1491   : > { %v1674_v43 = vsub.f32 %v2772_v60, %v1667_v39  ;;  %v1675_v44 = vadd.f32 %v1667_v39, %v2775_v61  ;;  %v2229_v45 = vpop.f32.mrb[47].mxu0 }
0x1493   : > { %1676 = vst.msk [vmem:[#allocation2] sm:$0xff] %vm472_vm2, %v1674_v43  ;;  %1677 = vst.msk [vmem:[%s2583_s22] sm:$0xff] %vm472_vm2, %v1675_v44 }
0x1494   : > { %2328 = shalt.err (!%p2325_p5)
}
0x1495   : > { %s2329_s20 = scalar_lea.hbm %s2822_s11, 128  ;;  %s2333_s21 = scalar_lea.hbm %s2881_s7, 256 }
0x1496   : > { %p2330_p6 = scmp.ne.s32.totalorder %s2822_s11, %s2329_s20  ;;  %p2334_p10 = scmp.lt.u32.totalorder %s2822_s11, %s2881_s7 }
0x1497   : > { %p2335_p11 = scmp.lt.u32.totalorder %s2333_s21, %s2329_s20  ;;  %p2337_p13 = scmp.lt.u32.totalorder %s2329_s20, %s2822_s11 }
0x1498   : > { %p2331_p7 = pnand %p2330_p6, %p2483_p4 }
0x1499   : > { %p2336_p12 = por %p2335_p11, %p2334_p10 }
0x149a   : > { %p2332_p9 = pneg %p2331_p7 }
0x149b   : > { %p2338_p0 = por %p2337_p13, %p2336_p12 }
0x149d   : > { %p2339_p1 = pnand %p2338_p0, %p2332_p9 }
0x149f   : > { %2342 = shalt.err (!%p2339_p1)
}
0x14a0   : > { %2230 = dma.vmem_to_hbm [thread:$0]  (%p2483_p4), %s2824_s23, 128, %s2822_s11, %s1681_s30  }
0x14a1 PF: > { %p2236_p2 = scmp.ge.s32.totalorder %s2393_s10, 2  ;;  %s1717_s14 = sand.u32 1, %s2373_s27  }
0x14a2   : > { %s1718_s16 = scalar_lea.sflag [#allocation4], %s1717_s14 }
0x14a3   : > { %p2233_p3 = pnand %p2236_p2, %p2490_p8 }
0x14a5   : > { %2368 = dma.done.wait (!%p2233_p3), %s1718_s16, 128  }
0x14a6   : > { %2370 = vsyncadd (!%p2233_p3), %s1718_s16, 4294967168  ;;  %s22_s10 = sadd.s32 1, %s2393_s10   ;;  %s2885_s27 = smov %s2377_s28 }
0x14a7   : > { %p19_p5 = scmp.ge.s32.totalorder %s22_s10, 4   ;;  %s2886_s28 = smov %s2381_s29 }
0x14a8   : > { %s2887_s29 = smov %s2496_s18  ;;  %s2888_s30 = smov %s2389_s9 }
0x14a9   : > { %s2889_s9 = smov %s2891_s13  ;;  %21 = sbr.rel (!%p19_p5) target bundleno = 4 (0x4), region = 135 }
0x14b0   :  { %1734 = vsyncpa [#allocation4], 1 }
0x14b1   :  { %1736 = vsyncpa [#allocation4 + $0x1], 1 }

</bundles_post_ra>
